<compile_context>
chip_gen: v5e
topology: v5e:2x2
jax: 0.10.0
libtpu: 0.0.40
codegen_flags: <defaults>
</compile_context>

<pallas_src>
import functools

import jax
import jax.numpy as jnp
from jax.experimental import pallas as pl
from jax.experimental.pallas import tpu as pltpu

# ---- constants (synthetic stand-ins for CONSTANTS.py) ----
CONVERSATIONAL_HIDDEN_DIM = 32
NEXT_PACKET_LAYERS = 2            # kernel hard-codes 2 LSTM layers
NEXT_PACKET_DROPOUT = 0.0         # eval-mode forward: dropout is identity
BYTE_CONTEXT_LEN = 4
BYTE_EMBED_DIM = 8
OUTPUT_VOCAB_DIM = 256
NULL = 256
SOS = 257
INT = 260                         # 256 bytes + special tokens

CATEGORICAL_DIMS = [10, 20]       # embed dims -> max(50, d//2) = 50 each
NUMERICAL_DIM = 4

CAT_EMBED_DIM = sum(max(50, d // 2) for d in CATEGORICAL_DIMS)
CONTEXT_DIM = CONVERSATIONAL_HIDDEN_DIM + CAT_EMBED_DIM + NUMERICAL_DIM
WIN_DIM = BYTE_CONTEXT_LEN * BYTE_EMBED_DIM
INPUT_SIZE = CONTEXT_DIM + WIN_DIM
HIDDEN = CONVERSATIONAL_HIDDEN_DIM

BULK_MM_DTYPE = jnp.bfloat16      # MXU-side dtype for weights/activations, f32 acc


def _round_up(x, m):
    return ((x + m - 1) // m) * m


def _cdiv(a, b):
    return -(-a // b)


def _lstm_decode_kernel(ctx_ref, win_ref, mask_ref,
                        wih0c_ref, wih0w_ref, whh0_ref, b0_ref,
                        wih1_ref, whh1_ref, b1_ref, wout_ref, bout_ref,
                        out_ref,
                        ctxg, h0s, c0s, h1s, c1s, gx, hbuf,
                        *, unroll=8):
    """One (batch-block, time-chunk) tile of the 2-layer LSTM decode + output proj."""
    TC, B, W = win_ref.shape
    H = h0s.shape[-1]
    chunk = pl.program_id(1)                  # axis 0 = batch block, axis 1 = time chunk

    @pl.when(chunk == 0)
    def _init():
        h0s[...] = jnp.zeros_like(h0s)
        c0s[...] = jnp.zeros_like(c0s)
        h1s[...] = jnp.zeros_like(h1s)
        c1s[...] = jnp.zeros_like(c1s)
        # Time-invariant context contribution to layer-0 gates (+ folded bias): once per
        # batch block instead of broadcast over T and re-multiplied every step.
        ctxg[...] = (jnp.dot(ctx_ref[...], wih0c_ref[...],
                             preferred_element_type=jnp.float32) + b0_ref[...])

    # Hoisted layer-0 input->hidden projection for the whole chunk (one MXU matmul,
    # M = TC*B, bf16 operands, f32 accumulation).
    win_flat = win_ref[...].reshape(TC * B, W).astype(wih0w_ref.dtype)
    gx[...] = (jnp.dot(win_flat, wih0w_ref[...],
                       preferred_element_type=jnp.float32).reshape(TC, B, 4 * H)
               + ctxg[...])

    whh0 = whh0_ref[...]                                  # bf16 [H, 4H]
    wih1 = wih1_ref[...]                                  # bf16 [H, 4H]
    whh1 = whh1_ref[...]                                  # bf16 [H, 4H]
    bf16 = whh0.dtype
    b1b = jnp.broadcast_to(b1_ref[...], (B, 4 * H))       # hoisted broadcast (once/chunk)

    def layer0(gxt, h0, c0):
        g = gxt + jnp.dot(h0.astype(bf16), whh0, preferred_element_type=jnp.float32)
        s = jax.nn.sigmoid(g)                             # i,f,o (full 128-lane EUP pass)
        gg = jnp.tanh(g[:, 2 * H:3 * H])                  # g gate only
        c_new = s[:, H:2 * H] * c0 + s[:, 0:H] * gg
        h_new = s[:, 3 * H:4 * H] * jnp.tanh(c_new)
        return h_new, c_new

    def layer1(t, h0_in, h1, c1):
        g = (jnp.dot(h0_in.astype(bf16), wih1, preferred_element_type=jnp.float32)
             + jnp.dot(h1.astype(bf16), whh1, preferred_element_type=jnp.float32)
             + b1b)                                       # two K=32 dots, no concat
        s = jax.nn.sigmoid(g)
        gg = jnp.tanh(g[:, 2 * H:3 * H])
        c_new = s[:, H:2 * H] * c1 + s[:, 0:H] * gg
        h_new = s[:, 3 * H:4 * H] * jnp.tanh(c_new)
        hbuf[t] = h_new
        return h_new, c_new

    # ---- wavefront-pipelined recurrence ----------------------------------------------
    # Iteration w computes layer-0 of step w+1 and layer-1 of step w; both depend only on
    # the previous iteration's carry, so they interleave on the MXU/EUP.  State lives in
    # vregs (loop carry), not VMEM.
    h0, c0 = h0s[...], c0s[...]
    h1, c1 = h1s[...], c1s[...]
    h0, c0 = layer0(gx[0], h0, c0)                        # prologue: layer-0 step 0

    n_wave = TC - 1
    warm = n_wave % unroll                                # peel so fori trip % unroll == 0
    for w in range(warm):                                 # static Python peel
        h0n, c0n = layer0(gx[w + 1], h0, c0)
        h1, c1 = layer1(w, h0, h1, c1)
        h0, c0 = h0n, c0n

    def wave(i, carry):
        h0, c0, h1, c1 = carry
        w = warm + i
        h0n, c0n = layer0(gx[w + 1], h0, c0)
        h1n, c1n = layer1(w, h0, h1, c1)
        return (h0n, c0n, h1n, c1n)

    n_loop = n_wave - warm
    if n_loop > 0:
        h0, c0, h1, c1 = jax.lax.fori_loop(0, n_loop, wave, (h0, c0, h1, c1),
                                           unroll=unroll)
    h1, c1 = layer1(TC - 1, h0, h1, c1)                   # epilogue: layer-1 step TC-1

    # State written back once per chunk (persists to the next time chunk).
    h0s[...] = h0
    c0s[...] = c0
    h1s[...] = h1
    c1s[...] = c1

    # pack_padded/pad_packed semantics: padded steps contribute zero hidden state.  The
    # mask is precomputed in the wrapper and applied once per chunk (no per-step mask).
    h_masked = (hbuf[...] * mask_ref[...]).astype(wout_ref.dtype).reshape(TC * B, H)
    out_ref[...] = (jnp.dot(h_masked, wout_ref[...],
                            preferred_element_type=jnp.float32)
                    .reshape(TC, B, wout_ref.shape[-1]) + bout_ref[...])


def init_params(key):
    ks = jax.random.split(key, 12)
    s = 0.05
    params = {
        "cat_emb": [s * jax.random.normal(ks[0], (CATEGORICAL_DIMS[0], 50), jnp.float32),
                    s * jax.random.normal(ks[1], (CATEGORICAL_DIMS[1], 50), jnp.float32)],
        "byte_emb": s * jax.random.normal(ks[2], (INT, BYTE_EMBED_DIM), jnp.float32),
        # layer 0: input_size -> 4H ; layer 1: H -> 4H  (gate order i,f,g,o)
        "w_ih0": s * jax.random.normal(ks[3], (INPUT_SIZE, 4 * HIDDEN), jnp.float32),
        "w_hh0": s * jax.random.normal(ks[4], (HIDDEN, 4 * HIDDEN), jnp.float32),
        "b0":    s * jax.random.normal(ks[5], (1, 4 * HIDDEN), jnp.float32),  # b_ih+b_hh folded
        "w_ih1": s * jax.random.normal(ks[6], (HIDDEN, 4 * HIDDEN), jnp.float32),
        "w_hh1": s * jax.random.normal(ks[7], (HIDDEN, 4 * HIDDEN), jnp.float32),
        "b1":    s * jax.random.normal(ks[8], (1, 4 * HIDDEN), jnp.float32),
        "w_out": s * jax.random.normal(ks[9], (HIDDEN, OUTPUT_VOCAB_DIM), jnp.float32),
        "b_out": s * jax.random.normal(ks[10], (1, OUTPUT_VOCAB_DIM), jnp.float32),
    }
    return params


def next_packet_predictor_forward(params, embedded_conversation_context,
                                  next_packet_categorical, next_packet_numerical,
                                  target_payload, max_len=None):
    """Teacher-forcing forward: returns logits [B, T_out, OUTPUT_VOCAB_DIM]."""
    B = embedded_conversation_context.shape[0]

    # categorical embeddings + context concat (glue, plain JAX)
    cat_embeds = [jnp.take(tbl, next_packet_categorical[:, i], axis=0)
                  for i, tbl in enumerate(params["cat_emb"])]
    cat_embeds = (jnp.concatenate(cat_embeds, axis=-1)
                  if cat_embeds else jnp.zeros((B, 0), jnp.float32))
    context = jnp.concatenate(
        [embedded_conversation_context, cat_embeds, next_packet_numerical], axis=-1)

    mask = target_payload != NULL
    payload_lens = mask.sum(1).astype(jnp.int32)
    if max_len is not None:
        T_out = int(max_len)          # static, jit-friendly path
    else:
        # TODO(synk): under jax.jit pass max_len explicitly; this device_get syncs.
        T_out = max(int(jax.device_get(jnp.max(payload_lens))), 1)

    # front-pad with NULLs + SOS, embed bytes, build sliding byte-context windows with a
    # single gather (no Python loop of per-step slices).
    prefix = jnp.concatenate(
        [jnp.full((B, BYTE_CONTEXT_LEN - 1), NULL, dtype=jnp.int32),
         jnp.full((B, 1), SOS, dtype=jnp.int32)], axis=-1)
    padded = jnp.concatenate([prefix, target_payload.astype(jnp.int32)], axis=-1)
    win_idx = jnp.arange(T_out)[:, None] + jnp.arange(BYTE_CONTEXT_LEN)[None, :]
    win_ids = padded[:, win_idx]                                         # [B, T_out, BCL]
    windows = jnp.take(params["byte_emb"], win_ids, axis=0).reshape(B, T_out, WIN_DIM)

    # NOTE: reference allocates lstm_input as torch.long (a bug that would crash
    # torch.nn.LSTM); intended float32 semantics are used here.  Context is not broadcast
    # over time -- its gate contribution is hoisted inside the kernel.
    windows_tm = jnp.transpose(windows, (1, 0, 2)).astype(jnp.float32)   # [T_out, B, 32]

    # ---- batch blocking: sublane multiple of 8; two blocks for large batches so the
    # "parallel" grid axis can use both v7x TensorCores ----
    if B >= 16:
        nb = 2
        B_blk = _round_up(_cdiv(B, nb), 8)
    else:
        nb = 1
        B_blk = _round_up(max(B, 1), 8)
    B_pad = nb * B_blk

    # ---- time chunking: grow TC until the chunk working set hits ~20 MiB of VMEM.
    # per (step,row) padded bytes: out 2x256, win 2x128(pad), mask 2x128(pad), gx 128,
    # hbuf 128 (pad) 32-bit words.
    per_step_bytes = B_blk * (2 * 256 + 2 * 128 + 2 * 128 + 128 + 128) * 4
    tc_cap = max(8, min(512, ((20 * 1024 * 1024) // per_step_bytes) // 8 * 8))
    n_chunks = _cdiv(T_out, tc_cap)
    TC = _round_up(_cdiv(T_out, n_chunks), 8)
    T_pad = n_chunks * TC
    vmem_limit = int(min(TC * per_step_bytes + 10 * 1024 * 1024, 56 * 1024 * 1024))
    unroll = 8 if B_blk <= 32 else 4

    # ---- padded operands + precomputed length mask ----
    context_p = jnp.pad(context, ((0, B_pad - B), (0, 0)))
    windows_p = jnp.pad(windows_tm, ((0, T_pad - T_out), (0, B_pad - B), (0, 0)))
    lens_pad = jnp.pad(payload_lens, (0, B_pad - B))                    # padded rows: len 0
    mask_p = (jnp.arange(T_pad, dtype=jnp.int32)[:, None] < lens_pad[None, :]
              ).astype(jnp.float32)[:, :, None]                        # [T_pad, B_pad, 1]

    # ---- weight prep: split w_ih0, bf16 for all MXU-side weights ----
    wih0_ctx = params["w_ih0"][:CONTEXT_DIM]                            # f32 (once/block)
    wih0_win = params["w_ih0"][CONTEXT_DIM:].astype(BULK_MM_DTYPE)      # [32, 4H]
    whh0_b = params["w_hh0"].astype(BULK_MM_DTYPE)
    wih1_b = params["w_ih1"].astype(BULK_MM_DTYPE)
    whh1_b = params["w_hh1"].astype(BULK_MM_DTYPE)
    wout_b = params["w_out"].astype(BULK_MM_DTYPE)

    bidx = lambda b, t: (b, 0)
    widx = lambda b, t: (0, 0)
    tidx = lambda b, t: (t, b, 0)
    grid_spec = pltpu.PrefetchScalarGridSpec(
        num_scalar_prefetch=0,
        grid=(nb, n_chunks),
        in_specs=[
            pl.BlockSpec((B_blk, CONTEXT_DIM), bidx),                   # context
            pl.BlockSpec((TC, B_blk, WIN_DIM), tidx),                   # byte windows
            pl.BlockSpec((TC, B_blk, 1), tidx),                         # length mask
            pl.BlockSpec((CONTEXT_DIM, 4 * HIDDEN), widx),              # w_ih0 (context)
            pl.BlockSpec((WIN_DIM, 4 * HIDDEN), widx),                  # w_ih0 (window)
            pl.BlockSpec((HIDDEN, 4 * HIDDEN), widx),                   # w_hh0
            pl.BlockSpec((1, 4 * HIDDEN), widx),                        # b0
            pl.BlockSpec((HIDDEN, 4 * HIDDEN), widx),                   # w_ih1
            pl.BlockSpec((HIDDEN, 4 * HIDDEN), widx),                   # w_hh1
            pl.BlockSpec((1, 4 * HIDDEN), widx),                        # b1
            pl.BlockSpec((HIDDEN, OUTPUT_VOCAB_DIM), widx),             # w_out
            pl.BlockSpec((1, OUTPUT_VOCAB_DIM), widx),                  # b_out
        ],
        out_specs=pl.BlockSpec((TC, B_blk, OUTPUT_VOCAB_DIM), tidx),
        scratch_shapes=[
            pltpu.VMEM((B_blk, 4 * HIDDEN), jnp.float32),               # ctxg
            pltpu.VMEM((B_blk, HIDDEN), jnp.float32),                   # h0
            pltpu.VMEM((B_blk, HIDDEN), jnp.float32),                   # c0
            pltpu.VMEM((B_blk, HIDDEN), jnp.float32),                   # h1
            pltpu.VMEM((B_blk, HIDDEN), jnp.float32),                   # c1
            pltpu.VMEM((TC, B_blk, 4 * HIDDEN), jnp.float32),           # gx
            pltpu.VMEM((TC, B_blk, HIDDEN), jnp.float32),               # hbuf
        ],
    )

    out_tm = pl.pallas_call(
        functools.partial(_lstm_decode_kernel, unroll=unroll),
        out_shape=jax.ShapeDtypeStruct((T_pad, B_pad, OUTPUT_VOCAB_DIM), jnp.float32),
        grid_spec=grid_spec,
        compiler_params=pltpu.CompilerParams(
            dimension_semantics=("parallel", "arbitrary"),   # batch || , time carries h/c
            vmem_limit_bytes=vmem_limit),
    )(context_p, windows_p, mask_p,
      wih0_ctx, wih0_win, whh0_b, params["b0"],
      wih1_b, whh1_b, params["b1"], wout_b, params["b_out"])

    # back to batch_first, strip batch/time padding
    return jnp.transpose(out_tm, (1, 0, 2))[:B, :T_out]


def _reference_forward(params, ectx, cat, num, target_payload):
    """Plain-JAX f32 reference of the teacher-forcing path (for validation)."""
    B = ectx.shape[0]
    cat_embeds = [jnp.take(tbl, cat[:, i], axis=0) for i, tbl in enumerate(params["cat_emb"])]
    context = jnp.concatenate([ectx] + cat_embeds + [num], axis=-1)
    lens = (target_payload != NULL).sum(1).astype(jnp.int32)
    T_out = max(int(jax.device_get(jnp.max(lens))), 1)
    prefix = jnp.concatenate([jnp.full((B, BYTE_CONTEXT_LEN - 1), NULL, jnp.int32),
                              jnp.full((B, 1), SOS, jnp.int32)], axis=-1)
    padded = jnp.concatenate([prefix, target_payload.astype(jnp.int32)], axis=-1)

    def cell(x, h, c, w_ih, w_hh, b):
        g = x @ w_ih + h @ w_hh + b
        i = jax.nn.sigmoid(g[:, :HIDDEN])
        f = jax.nn.sigmoid(g[:, HIDDEN:2 * HIDDEN])
        gg = jnp.tanh(g[:, 2 * HIDDEN:3 * HIDDEN])
        o = jax.nn.sigmoid(g[:, 3 * HIDDEN:])
        c_new = f * c + i * gg
        return o * jnp.tanh(c_new), c_new

    h0 = c0 = h1 = c1 = jnp.zeros((B, HIDDEN), jnp.float32)
    outs = []
    for t in range(T_out):
        win = jnp.take(params["byte_emb"], padded[:, t:t + BYTE_CONTEXT_LEN],
                       axis=0).reshape(B, WIN_DIM)
        x = jnp.concatenate([context, win], axis=-1)
        h0, c0 = cell(x, h0, c0, params["w_ih0"], params["w_hh0"], params["b0"])
        h1, c1 = cell(h0, h1, c1, params["w_ih1"], params["w_hh1"], params["b1"])
        valid = (t < lens)[:, None].astype(jnp.float32)
        outs.append((h1 * valid) @ params["w_out"] + params["b_out"])
    return jnp.stack(outs, axis=1)


if __name__ == "__main__":
    key = jax.random.PRNGKey(0)
    pkey, dkey = jax.random.split(key)
    params = init_params(pkey)

    B, T = 2, 8
    k1, k2, k3, k4 = jax.random.split(dkey, 4)
    embedded_conversation_context = jax.random.normal(
        k1, (B, CONVERSATIONAL_HIDDEN_DIM), jnp.float32)
    next_packet_categorical = jnp.stack(
        [jax.random.randint(k2, (B,), 0, CATEGORICAL_DIMS[0]),
         jax.random.randint(k3, (B,), 0, CATEGORICAL_DIMS[1])], axis=1).astype(jnp.int32)
    next_packet_numerical = jax.random.normal(k4, (B, NUMERICAL_DIM), jnp.float32)

    # target payload: sample 0 full length 8, sample 1 length 5 (NULL-padded at the end)
    bytes_ = jax.random.randint(jax.random.PRNGKey(42), (B, T), 0, 256).astype(jnp.int32)
    valid_mask = jnp.array([[1] * 8, [1] * 5 + [0] * 3], dtype=jnp.int32)
    target_payload = jnp.where(valid_mask == 1, bytes_, NULL)

    logits = next_packet_predictor_forward(
        params, embedded_conversation_context, next_packet_categorical,
        next_packet_numerical, target_payload)
    logits = jax.block_until_ready(logits)

    assert logits.shape == (B, T, OUTPUT_VOCAB_DIM), logits.shape
    assert bool(jnp.all(jnp.isfinite(logits)))

    ref = _reference_forward(params, embedded_conversation_context,
                             next_packet_categorical, next_packet_numerical,
                             target_payload)
    ref = jax.block_until_ready(ref)
    assert bool(jnp.allclose(logits, ref, atol=2e-3, rtol=2e-2)), (
        float(jnp.max(jnp.abs(logits - ref))))
    # TODO(synk): _generate_payload (autoregressive argmax decode) not implemented; only
    # the teacher-forcing training path is kernelized.
    print("KERNEL_OK")
</pallas_src>

<mosaic_0001>
module attributes {stable_mosaic.version = 11 : i64} {
  func.func @_lstm_decode_kernel(%arg0: i32, %arg1: i32, %arg2: memref<8x136xf32, #tpu.memory_space<vmem>>, %arg3: memref<8x8x32xf32, #tpu.memory_space<vmem>>, %arg4: memref<8x8x1xf32, #tpu.memory_space<vmem>>, %arg5: memref<136x128xf32, #tpu.memory_space<vmem>>, %arg6: memref<32x128xbf16, #tpu.memory_space<vmem>>, %arg7: memref<32x128xbf16, #tpu.memory_space<vmem>>, %arg8: memref<1x128xf32, #tpu.memory_space<vmem>>, %arg9: memref<32x128xbf16, #tpu.memory_space<vmem>>, %arg10: memref<32x128xbf16, #tpu.memory_space<vmem>>, %arg11: memref<1x128xf32, #tpu.memory_space<vmem>>, %arg12: memref<32x256xbf16, #tpu.memory_space<vmem>>, %arg13: memref<1x256xf32, #tpu.memory_space<vmem>>, %arg14: memref<8x8x256xf32, #tpu.memory_space<vmem>>, %arg15: memref<8x128xf32, #tpu.memory_space<vmem>>, %arg16: memref<8x32xf32, #tpu.memory_space<vmem>>, %arg17: memref<8x32xf32, #tpu.memory_space<vmem>>, %arg18: memref<8x32xf32, #tpu.memory_space<vmem>>, %arg19: memref<8x32xf32, #tpu.memory_space<vmem>>, %arg20: memref<8x8x128xf32, #tpu.memory_space<vmem>>, %arg21: memref<8x8x32xf32, #tpu.memory_space<vmem>>) attributes {dimension_semantics = [#tpu.dimension_semantics<parallel>, #tpu.dimension_semantics<arbitrary>], iteration_bounds = array<i64: 1, 1>, scalar_prefetch = 0 : i64, scratch_operands = 7 : i64, tpu.core_type = #tpu.core_type<tc>, window_params = [{transform_indices = @transform_0, window_bounds = array<i64: 8, 136>}, {transform_indices = @transform_1, window_bounds = array<i64: 8, 8, 32>}, {transform_indices = @transform_2, window_bounds = array<i64: 8, 8, 1>}, {pipeline_mode = #tpu.pipeline_mode<synchronous>, transform_indices = @transform_3, window_bounds = array<i64: 136, 128>}, {pipeline_mode = #tpu.pipeline_mode<synchronous>, transform_indices = @transform_4, window_bounds = array<i64: 32, 128>}, {pipeline_mode = #tpu.pipeline_mode<synchronous>, transform_indices = @transform_5, window_bounds = array<i64: 32, 128>}, {pipeline_mode = #tpu.pipeline_mode<synchronous>, transform_indices = @transform_6, window_bounds = array<i64: 1, 128>}, {pipeline_mode = #tpu.pipeline_mode<synchronous>, transform_indices = @transform_7, window_bounds = array<i64: 32, 128>}, {pipeline_mode = #tpu.pipeline_mode<synchronous>, transform_indices = @transform_8, window_bounds = array<i64: 32, 128>}, {pipeline_mode = #tpu.pipeline_mode<synchronous>, transform_indices = @transform_9, window_bounds = array<i64: 1, 128>}, {pipeline_mode = #tpu.pipeline_mode<synchronous>, transform_indices = @transform_10, window_bounds = array<i64: 32, 256>}, {pipeline_mode = #tpu.pipeline_mode<synchronous>, transform_indices = @transform_11, window_bounds = array<i64: 1, 256>}, {transform_indices = @transform_12, window_bounds = array<i64: 8, 8, 256>}]} {
    %c0_i32 = arith.constant 0 : i32
    %0 = arith.cmpi eq, %arg1, %c0_i32 : i32
    %1 = arith.extui %0 : i1 to i32
    %c0_i32_0 = arith.constant 0 : i32
    %2 = arith.cmpi ne, %1, %c0_i32_0 : i32
    scf.if %2 {
      %cst_129 = arith.constant 0.000000e+00 : f32
      %394 = vector.broadcast %cst_129 : f32 to vector<8x32xf32>
      %c0_130 = arith.constant 0 : index
      %c0_131 = arith.constant 0 : index
      %395 = vector.load %arg16[%c0_130, %c0_131] : memref<8x32xf32, #tpu.memory_space<vmem>>, vector<8x32xf32>
      tpu.vector_store %arg16[%c0_130, %c0_131], %394 {strides = array<i32>} : memref<8x32xf32, #tpu.memory_space<vmem>>, vector<8x32xf32>,
      %cst_132 = arith.constant 0.000000e+00 : f32
      %396 = vector.broadcast %cst_132 : f32 to vector<8x32xf32>
      %c0_133 = arith.constant 0 : index
      %c0_134 = arith.constant 0 : index
      %397 = vector.load %arg17[%c0_133, %c0_134] : memref<8x32xf32, #tpu.memory_space<vmem>>, vector<8x32xf32>
      tpu.vector_store %arg17[%c0_133, %c0_134], %396 {strides = array<i32>} : memref<8x32xf32, #tpu.memory_space<vmem>>, vector<8x32xf32>,
      %cst_135 = arith.constant 0.000000e+00 : f32
      %398 = vector.broadcast %cst_135 : f32 to vector<8x32xf32>
      %c0_136 = arith.constant 0 : index
      %c0_137 = arith.constant 0 : index
      %399 = vector.load %arg18[%c0_136, %c0_137] : memref<8x32xf32, #tpu.memory_space<vmem>>, vector<8x32xf32>
      tpu.vector_store %arg18[%c0_136, %c0_137], %398 {strides = array<i32>} : memref<8x32xf32, #tpu.memory_space<vmem>>, vector<8x32xf32>,
      %cst_138 = arith.constant 0.000000e+00 : f32
      %400 = vector.broadcast %cst_138 : f32 to vector<8x32xf32>
      %c0_139 = arith.constant 0 : index
      %c0_140 = arith.constant 0 : index
      %401 = vector.load %arg19[%c0_139, %c0_140] : memref<8x32xf32, #tpu.memory_space<vmem>>, vector<8x32xf32>
      tpu.vector_store %arg19[%c0_139, %c0_140], %400 {strides = array<i32>} : memref<8x32xf32, #tpu.memory_space<vmem>>, vector<8x32xf32>,
      %c0_141 = arith.constant 0 : index
      %c0_142 = arith.constant 0 : index
      %402 = vector.load %arg2[%c0_141, %c0_142] : memref<8x136xf32, #tpu.memory_space<vmem>>, vector<8x136xf32>
      %c0_143 = arith.constant 0 : index
      %c0_144 = arith.constant 0 : index
      %403 = vector.load %arg5[%c0_143, %c0_144] : memref<136x128xf32, #tpu.memory_space<vmem>>, vector<136x128xf32>
      %cst_145 = arith.constant dense<0.000000e+00> : vector<8x128xf32>
      %404 = tpu.matmul %402, %403, %cst_145 {dimension_numbers = #tpu.dot_dimension_numbers<[1], [0], [0], [1], [0, 0, 1, 1], [], []>} : vector<8x136xf32>, vector<136x128xf32>, vector<8x128xf32> -> vector<8x128xf32>
      %c0_146 = arith.constant 0 : index
      %c0_147 = arith.constant 0 : index
      %405 = vector.load %arg8[%c0_146, %c0_147] : memref<1x128xf32, #tpu.memory_space<vmem>>, vector<1x128xf32>
      %406 = vector.broadcast %405 : vector<1x128xf32> to vector<8x128xf32>
      %407 = arith.addf %404, %406 : vector<8x128xf32>
      %c0_148 = arith.constant 0 : index
      %c0_149 = arith.constant 0 : index
      %408 = vector.load %arg15[%c0_148, %c0_149] : memref<8x128xf32, #tpu.memory_space<vmem>>, vector<8x128xf32>
      tpu.vector_store %arg15[%c0_148, %c0_149], %407 {strides = array<i32>} : memref<8x128xf32, #tpu.memory_space<vmem>>, vector<8x128xf32>,
    } else {
    }
    %c0 = arith.constant 0 : index
    %c0_1 = arith.constant 0 : index
    %c0_2 = arith.constant 0 : index
    %3 = vector.load %arg3[%c0, %c0_1, %c0_2] : memref<8x8x32xf32, #tpu.memory_space<vmem>>, vector<8x8x32xf32>
    %4 = vector.shape_cast %3 : vector<8x8x32xf32> to vector<64x32xf32>
    %5 = arith.truncf %4 : vector<64x32xf32> to vector<64x32xbf16>
    %c0_3 = arith.constant 0 : index
    %c0_4 = arith.constant 0 : index
    %6 = vector.load %arg6[%c0_3, %c0_4] : memref<32x128xbf16, #tpu.memory_space<vmem>>, vector<32x128xbf16>
    %cst = arith.constant dense<0.000000e+00> : vector<64x128xf32>
    %7 = tpu.matmul %5, %6, %cst {dimension_numbers = #tpu.dot_dimension_numbers<[1], [0], [0], [1], [0, 0, 1, 1], [], []>} : vector<64x32xbf16>, vector<32x128xbf16>, vector<64x128xf32> -> vector<64x128xf32>
    %8 = vector.shape_cast %7 : vector<64x128xf32> to vector<8x8x128xf32>
    %c0_5 = arith.constant 0 : index
    %c0_6 = arith.constant 0 : index
    %9 = vector.load %arg15[%c0_5, %c0_6] : memref<8x128xf32, #tpu.memory_space<vmem>>, vector<8x128xf32>
    %10 = vector.shape_cast %9 : vector<8x128xf32> to vector<1x8x128xf32>
    %11 = vector.broadcast %10 : vector<1x8x128xf32> to vector<8x8x128xf32>
    %12 = arith.addf %8, %11 : vector<8x8x128xf32>
    %c0_7 = arith.constant 0 : index
    %c0_8 = arith.constant 0 : index
    %c0_9 = arith.constant 0 : index
    %13 = vector.load %arg20[%c0_7, %c0_8, %c0_9] : memref<8x8x128xf32, #tpu.memory_space<vmem>>, vector<8x8x128xf32>
    tpu.vector_store %arg20[%c0_7, %c0_8, %c0_9], %12 {strides = array<i32>} : memref<8x8x128xf32, #tpu.memory_space<vmem>>, vector<8x8x128xf32>,
    %c0_10 = arith.constant 0 : index
    %c0_11 = arith.constant 0 : index
    %14 = vector.load %arg7[%c0_10, %c0_11] : memref<32x128xbf16, #tpu.memory_space<vmem>>, vector<32x128xbf16>
    %c0_12 = arith.constant 0 : index
    %c0_13 = arith.constant 0 : index
    %15 = vector.load %arg9[%c0_12, %c0_13] : memref<32x128xbf16, #tpu.memory_space<vmem>>, vector<32x128xbf16>
    %c0_14 = arith.constant 0 : index
    %c0_15 = arith.constant 0 : index
    %16 = vector.load %arg10[%c0_14, %c0_15] : memref<32x128xbf16, #tpu.memory_space<vmem>>, vector<32x128xbf16>
    %c0_16 = arith.constant 0 : index
    %c0_17 = arith.constant 0 : index
    %17 = vector.load %arg11[%c0_16, %c0_17] : memref<1x128xf32, #tpu.memory_space<vmem>>, vector<1x128xf32>
    %18 = vector.shape_cast %17 : vector<1x128xf32> to vector<1x128xf32>
    %19 = vector.broadcast %18 : vector<1x128xf32> to vector<8x128xf32>
    %c0_18 = arith.constant 0 : index
    %c0_19 = arith.constant 0 : index
    %20 = vector.load %arg16[%c0_18, %c0_19] : memref<8x32xf32, #tpu.memory_space<vmem>>, vector<8x32xf32>
    %c0_20 = arith.constant 0 : index
    %c0_21 = arith.constant 0 : index
    %21 = vector.load %arg17[%c0_20, %c0_21] : memref<8x32xf32, #tpu.memory_space<vmem>>, vector<8x32xf32>
    %c0_22 = arith.constant 0 : index
    %c0_23 = arith.constant 0 : index
    %22 = vector.load %arg18[%c0_22, %c0_23] : memref<8x32xf32, #tpu.memory_space<vmem>>, vector<8x32xf32>
    %c0_24 = arith.constant 0 : index
    %c0_25 = arith.constant 0 : index
    %23 = vector.load %arg19[%c0_24, %c0_25] : memref<8x32xf32, #tpu.memory_space<vmem>>, vector<8x32xf32>
    %c0_26 = arith.constant 0 : index
    %c0_27 = arith.constant 0 : index
    %c0_28 = arith.constant 0 : index
    %24 = vector.load %arg20[%c0_26, %c0_27, %c0_28] : memref<8x8x128xf32, #tpu.memory_space<vmem>>, vector<1x8x128xf32>
    %25 = vector.shape_cast %24 : vector<1x8x128xf32> to vector<8x128xf32>
    %26 = arith.truncf %20 : vector<8x32xf32> to vector<8x32xbf16>
    %cst_29 = arith.constant dense<0.000000e+00> : vector<8x128xf32>
    %27 = tpu.matmul %26, %14, %cst_29 {dimension_numbers = #tpu.dot_dimension_numbers<[1], [0], [0], [1], [0, 0, 1, 1], [], []>} : vector<8x32xbf16>, vector<32x128xbf16>, vector<8x128xf32> -> vector<8x128xf32>
    %28 = arith.addf %25, %27 : vector<8x128xf32>
    %29 = arith.negf %28 : vector<8x128xf32>
    %30 = math.exp %29 : vector<8x128xf32>
    %cst_30 = arith.constant 1.000000e+00 : f32
    %31 = vector.broadcast %cst_30 : f32 to vector<8x128xf32>
    %32 = arith.addf %31, %30 : vector<8x128xf32>
    %33 = arith.divf %31, %32 : vector<8x128xf32>
    %34 = vector.extract_strided_slice %28 {offsets = [0, 64], sizes = [8, 32], strides = [1, 1]} : vector<8x128xf32> to vector<8x32xf32>
    %35 = math.tanh %34 : vector<8x32xf32>
    %36 = vector.extract_strided_slice %33 {offsets = [0, 32], sizes = [8, 32], strides = [1, 1]} : vector<8x128xf32> to vector<8x32xf32>
    %37 = arith.mulf %36, %21 : vector<8x32xf32>
    %38 = vector.extract_strided_slice %33 {offsets = [0, 0], sizes = [8, 32], strides = [1, 1]} : vector<8x128xf32> to vector<8x32xf32>
    %39 = arith.mulf %38, %35 : vector<8x32xf32>
    %40 = arith.addf %37, %39 : vector<8x32xf32>
    %41 = vector.extract_strided_slice %33 {offsets = [0, 96], sizes = [8, 32], strides = [1, 1]} : vector<8x128xf32> to vector<8x32xf32>
    %42 = math.tanh %40 : vector<8x32xf32>
    %43 = arith.mulf %41, %42 : vector<8x32xf32>
    %c1 = arith.constant 1 : index
    %c0_31 = arith.constant 0 : index
    %c0_32 = arith.constant 0 : index
    %44 = vector.load %arg20[%c1, %c0_31, %c0_32] : memref<8x8x128xf32, #tpu.memory_space<vmem>>, vector<1x8x128xf32>
    %45 = vector.shape_cast %44 : vector<1x8x128xf32> to vector<8x128xf32>
    %46 = arith.truncf %43 : vector<8x32xf32> to vector<8x32xbf16>
    %cst_33 = arith.constant dense<0.000000e+00> : vector<8x128xf32>
    %47 = tpu.matmul %46, %14, %cst_33 {dimension_numbers = #tpu.dot_dimension_numbers<[1], [0], [0], [1], [0, 0, 1, 1], [], []>} : vector<8x32xbf16>, vector<32x128xbf16>, vector<8x128xf32> -> vector<8x128xf32>
    %48 = arith.addf %45, %47 : vector<8x128xf32>
    %49 = arith.negf %48 : vector<8x128xf32>
    %50 = math.exp %49 : vector<8x128xf32>
    %cst_34 = arith.constant 1.000000e+00 : f32
    %51 = vector.broadcast %cst_34 : f32 to vector<8x128xf32>
    %52 = arith.addf %51, %50 : vector<8x128xf32>
    %53 = arith.divf %51, %52 : vector<8x128xf32>
    %54 = vector.extract_strided_slice %48 {offsets = [0, 64], sizes = [8, 32], strides = [1, 1]} : vector<8x128xf32> to vector<8x32xf32>
    %55 = math.tanh %54 : vector<8x32xf32>
    %56 = vector.extract_strided_slice %53 {offsets = [0, 32], sizes = [8, 32], strides = [1, 1]} : vector<8x128xf32> to vector<8x32xf32>
    %57 = arith.mulf %56, %40 : vector<8x32xf32>
    %58 = vector.extract_strided_slice %53 {offsets = [0, 0], sizes = [8, 32], strides = [1, 1]} : vector<8x128xf32> to vector<8x32xf32>
    %59 = arith.mulf %58, %55 : vector<8x32xf32>
    %60 = arith.addf %57, %59 : vector<8x32xf32>
    %61 = vector.extract_strided_slice %53 {offsets = [0, 96], sizes = [8, 32], strides = [1, 1]} : vector<8x128xf32> to vector<8x32xf32>
    %62 = math.tanh %60 : vector<8x32xf32>
    %63 = arith.mulf %61, %62 : vector<8x32xf32>
    %64 = arith.truncf %43 : vector<8x32xf32> to vector<8x32xbf16>
    %cst_35 = arith.constant dense<0.000000e+00> : vector<8x128xf32>
    %65 = tpu.matmul %64, %15, %cst_35 {dimension_numbers = #tpu.dot_dimension_numbers<[1], [0], [0], [1], [0, 0, 1, 1], [], []>} : vector<8x32xbf16>, vector<32x128xbf16>, vector<8x128xf32> -> vector<8x128xf32>
    %66 = arith.truncf %22 : vector<8x32xf32> to vector<8x32xbf16>
    %cst_36 = arith.constant dense<0.000000e+00> : vector<8x128xf32>
    %67 = tpu.matmul %66, %16, %cst_36 {dimension_numbers = #tpu.dot_dimension_numbers<[1], [0], [0], [1], [0, 0, 1, 1], [], []>} : vector<8x32xbf16>, vector<32x128xbf16>, vector<8x128xf32> -> vector<8x128xf32>
    %68 = arith.addf %65, %67 : vector<8x128xf32>
    %69 = arith.addf %68, %19 : vector<8x128xf32>
    %70 = arith.negf %69 : vector<8x128xf32>
    %71 = math.exp %70 : vector<8x128xf32>
    %cst_37 = arith.constant 1.000000e+00 : f32
    %72 = vector.broadcast %cst_37 : f32 to vector<8x128xf32>
    %73 = arith.addf %72, %71 : vector<8x128xf32>
    %74 = arith.divf %72, %73 : vector<8x128xf32>
    %75 = vector.extract_strided_slice %69 {offsets = [0, 64], sizes = [8, 32], strides = [1, 1]} : vector<8x128xf32> to vector<8x32xf32>
    %76 = math.tanh %75 : vector<8x32xf32>
    %77 = vector.extract_strided_slice %74 {offsets = [0, 32], sizes = [8, 32], strides = [1, 1]} : vector<8x128xf32> to vector<8x32xf32>
    %78 = arith.mulf %77, %23 : vector<8x32xf32>
    %79 = vector.extract_strided_slice %74 {offsets = [0, 0], sizes = [8, 32], strides = [1, 1]} : vector<8x128xf32> to vector<8x32xf32>
    %80 = arith.mulf %79, %76 : vector<8x32xf32>
    %81 = arith.addf %78, %80 : vector<8x32xf32>
    %82 = vector.extract_strided_slice %74 {offsets = [0, 96], sizes = [8, 32], strides = [1, 1]} : vector<8x128xf32> to vector<8x32xf32>
    %83 = math.tanh %81 : vector<8x32xf32>
    %84 = arith.mulf %82, %83 : vector<8x32xf32>
    %c0_38 = arith.constant 0 : index
    %c0_39 = arith.constant 0 : index
    %c0_40 = arith.constant 0 : index
    %85 = vector.load %arg21[%c0_38, %c0_39, %c0_40] : memref<8x8x32xf32, #tpu.memory_space<vmem>>, vector<1x8x32xf32>
    %86 = vector.shape_cast %85 : vector<1x8x32xf32> to vector<8x32xf32>
    %87 = vector.shape_cast %84 : vector<8x32xf32> to vector<1x8x32xf32>
    tpu.vector_store %arg21[%c0_38, %c0_39, %c0_40], %87 {strides = array<i32>} : memref<8x8x32xf32, #tpu.memory_space<vmem>>, vector<1x8x32xf32>,
    %c2 = arith.constant 2 : index
    %c0_41 = arith.constant 0 : index
    %c0_42 = arith.constant 0 : index
    %88 = vector.load %arg20[%c2, %c0_41, %c0_42] : memref<8x8x128xf32, #tpu.memory_space<vmem>>, vector<1x8x128xf32>
    %89 = vector.shape_cast %88 : vector<1x8x128xf32> to vector<8x128xf32>
    %90 = arith.truncf %63 : vector<8x32xf32> to vector<8x32xbf16>
    %cst_43 = arith.constant dense<0.000000e+00> : vector<8x128xf32>
    %91 = tpu.matmul %90, %14, %cst_43 {dimension_numbers = #tpu.dot_dimension_numbers<[1], [0], [0], [1], [0, 0, 1, 1], [], []>} : vector<8x32xbf16>, vector<32x128xbf16>, vector<8x128xf32> -> vector<8x128xf32>
    %92 = arith.addf %89, %91 : vector<8x128xf32>
    %93 = arith.negf %92 : vector<8x128xf32>
    %94 = math.exp %93 : vector<8x128xf32>
    %cst_44 = arith.constant 1.000000e+00 : f32
    %95 = vector.broadcast %cst_44 : f32 to vector<8x128xf32>
    %96 = arith.addf %95, %94 : vector<8x128xf32>
    %97 = arith.divf %95, %96 : vector<8x128xf32>
    %98 = vector.extract_strided_slice %92 {offsets = [0, 64], sizes = [8, 32], strides = [1, 1]} : vector<8x128xf32> to vector<8x32xf32>
    %99 = math.tanh %98 : vector<8x32xf32>
    %100 = vector.extract_strided_slice %97 {offsets = [0, 32], sizes = [8, 32], strides = [1, 1]} : vector<8x128xf32> to vector<8x32xf32>
    %101 = arith.mulf %100, %60 : vector<8x32xf32>
    %102 = vector.extract_strided_slice %97 {offsets = [0, 0], sizes = [8, 32], strides = [1, 1]} : vector<8x128xf32> to vector<8x32xf32>
    %103 = arith.mulf %102, %99 : vector<8x32xf32>
    %104 = arith.addf %101, %103 : vector<8x32xf32>
    %105 = vector.extract_strided_slice %97 {offsets = [0, 96], sizes = [8, 32], strides = [1, 1]} : vector<8x128xf32> to vector<8x32xf32>
    %106 = math.tanh %104 : vector<8x32xf32>
    %107 = arith.mulf %105, %106 : vector<8x32xf32>
    %108 = arith.truncf %63 : vector<8x32xf32> to vector<8x32xbf16>
    %cst_45 = arith.constant dense<0.000000e+00> : vector<8x128xf32>
    %109 = tpu.matmul %108, %15, %cst_45 {dimension_numbers = #tpu.dot_dimension_numbers<[1], [0], [0], [1], [0, 0, 1, 1], [], []>} : vector<8x32xbf16>, vector<32x128xbf16>, vector<8x128xf32> -> vector<8x128xf32>
    %110 = arith.truncf %84 : vector<8x32xf32> to vector<8x32xbf16>
    %cst_46 = arith.constant dense<0.000000e+00> : vector<8x128xf32>
    %111 = tpu.matmul %110, %16, %cst_46 {dimension_numbers = #tpu.dot_dimension_numbers<[1], [0], [0], [1], [0, 0, 1, 1], [], []>} : vector<8x32xbf16>, vector<32x128xbf16>, vector<8x128xf32> -> vector<8x128xf32>
    %112 = arith.addf %109, %111 : vector<8x128xf32>
    %113 = arith.addf %112, %19 : vector<8x128xf32>
    %114 = arith.negf %113 : vector<8x128xf32>
    %115 = math.exp %114 : vector<8x128xf32>
    %cst_47 = arith.constant 1.000000e+00 : f32
    %116 = vector.broadcast %cst_47 : f32 to vector<8x128xf32>
    %117 = arith.addf %116, %115 : vector<8x128xf32>
    %118 = arith.divf %116, %117 : vector<8x128xf32>
    %119 = vector.extract_strided_slice %113 {offsets = [0, 64], sizes = [8, 32], strides = [1, 1]} : vector<8x128xf32> to vector<8x32xf32>
    %120 = math.tanh %119 : vector<8x32xf32>
    %121 = vector.extract_strided_slice %118 {offsets = [0, 32], sizes = [8, 32], strides = [1, 1]} : vector<8x128xf32> to vector<8x32xf32>
    %122 = arith.mulf %121, %81 : vector<8x32xf32>
    %123 = vector.extract_strided_slice %118 {offsets = [0, 0], sizes = [8, 32], strides = [1, 1]} : vector<8x128xf32> to vector<8x32xf32>
    %124 = arith.mulf %123, %120 : vector<8x32xf32>
    %125 = arith.addf %122, %124 : vector<8x32xf32>
    %126 = vector.extract_strided_slice %118 {offsets = [0, 96], sizes = [8, 32], strides = [1, 1]} : vector<8x128xf32> to vector<8x32xf32>
    %127 = math.tanh %125 : vector<8x32xf32>
    %128 = arith.mulf %126, %127 : vector<8x32xf32>
    %c1_48 = arith.constant 1 : index
    %c0_49 = arith.constant 0 : index
    %c0_50 = arith.constant 0 : index
    %129 = vector.load %arg21[%c1_48, %c0_49, %c0_50] : memref<8x8x32xf32, #tpu.memory_space<vmem>>, vector<1x8x32xf32>
    %130 = vector.shape_cast %129 : vector<1x8x32xf32> to vector<8x32xf32>
    %131 = vector.shape_cast %128 : vector<8x32xf32> to vector<1x8x32xf32>
    tpu.vector_store %arg21[%c1_48, %c0_49, %c0_50], %131 {strides = array<i32>} : memref<8x8x32xf32, #tpu.memory_space<vmem>>, vector<1x8x32xf32>,
    %c3 = arith.constant 3 : index
    %c0_51 = arith.constant 0 : index
    %c0_52 = arith.constant 0 : index
    %132 = vector.load %arg20[%c3, %c0_51, %c0_52] : memref<8x8x128xf32, #tpu.memory_space<vmem>>, vector<1x8x128xf32>
    %133 = vector.shape_cast %132 : vector<1x8x128xf32> to vector<8x128xf32>
    %134 = arith.truncf %107 : vector<8x32xf32> to vector<8x32xbf16>
    %cst_53 = arith.constant dense<0.000000e+00> : vector<8x128xf32>
    %135 = tpu.matmul %134, %14, %cst_53 {dimension_numbers = #tpu.dot_dimension_numbers<[1], [0], [0], [1], [0, 0, 1, 1], [], []>} : vector<8x32xbf16>, vector<32x128xbf16>, vector<8x128xf32> -> vector<8x128xf32>
    %136 = arith.addf %133, %135 : vector<8x128xf32>
    %137 = arith.negf %136 : vector<8x128xf32>
    %138 = math.exp %137 : vector<8x128xf32>
    %cst_54 = arith.constant 1.000000e+00 : f32
    %139 = vector.broadcast %cst_54 : f32 to vector<8x128xf32>
    %140 = arith.addf %139, %138 : vector<8x128xf32>
    %141 = arith.divf %139, %140 : vector<8x128xf32>
    %142 = vector.extract_strided_slice %136 {offsets = [0, 64], sizes = [8, 32], strides = [1, 1]} : vector<8x128xf32> to vector<8x32xf32>
    %143 = math.tanh %142 : vector<8x32xf32>
    %144 = vector.extract_strided_slice %141 {offsets = [0, 32], sizes = [8, 32], strides = [1, 1]} : vector<8x128xf32> to vector<8x32xf32>
    %145 = arith.mulf %144, %104 : vector<8x32xf32>
    %146 = vector.extract_strided_slice %141 {offsets = [0, 0], sizes = [8, 32], strides = [1, 1]} : vector<8x128xf32> to vector<8x32xf32>
    %147 = arith.mulf %146, %143 : vector<8x32xf32>
    %148 = arith.addf %145, %147 : vector<8x32xf32>
    %149 = vector.extract_strided_slice %141 {offsets = [0, 96], sizes = [8, 32], strides = [1, 1]} : vector<8x128xf32> to vector<8x32xf32>
    %150 = math.tanh %148 : vector<8x32xf32>
    %151 = arith.mulf %149, %150 : vector<8x32xf32>
    %152 = arith.truncf %107 : vector<8x32xf32> to vector<8x32xbf16>
    %cst_55 = arith.constant dense<0.000000e+00> : vector<8x128xf32>
    %153 = tpu.matmul %152, %15, %cst_55 {dimension_numbers = #tpu.dot_dimension_numbers<[1], [0], [0], [1], [0, 0, 1, 1], [], []>} : vector<8x32xbf16>, vector<32x128xbf16>, vector<8x128xf32> -> vector<8x128xf32>
    %154 = arith.truncf %128 : vector<8x32xf32> to vector<8x32xbf16>
    %cst_56 = arith.constant dense<0.000000e+00> : vector<8x128xf32>
    %155 = tpu.matmul %154, %16, %cst_56 {dimension_numbers = #tpu.dot_dimension_numbers<[1], [0], [0], [1], [0, 0, 1, 1], [], []>} : vector<8x32xbf16>, vector<32x128xbf16>, vector<8x128xf32> -> vector<8x128xf32>
    %156 = arith.addf %153, %155 : vector<8x128xf32>
    %157 = arith.addf %156, %19 : vector<8x128xf32>
    %158 = arith.negf %157 : vector<8x128xf32>
    %159 = math.exp %158 : vector<8x128xf32>
    %cst_57 = arith.constant 1.000000e+00 : f32
    %160 = vector.broadcast %cst_57 : f32 to vector<8x128xf32>
    %161 = arith.addf %160, %159 : vector<8x128xf32>
    %162 = arith.divf %160, %161 : vector<8x128xf32>
    %163 = vector.extract_strided_slice %157 {offsets = [0, 64], sizes = [8, 32], strides = [1, 1]} : vector<8x128xf32> to vector<8x32xf32>
    %164 = math.tanh %163 : vector<8x32xf32>
    %165 = vector.extract_strided_slice %162 {offsets = [0, 32], sizes = [8, 32], strides = [1, 1]} : vector<8x128xf32> to vector<8x32xf32>
    %166 = arith.mulf %165, %125 : vector<8x32xf32>
    %167 = vector.extract_strided_slice %162 {offsets = [0, 0], sizes = [8, 32], strides = [1, 1]} : vector<8x128xf32> to vector<8x32xf32>
    %168 = arith.mulf %167, %164 : vector<8x32xf32>
    %169 = arith.addf %166, %168 : vector<8x32xf32>
    %170 = vector.extract_strided_slice %162 {offsets = [0, 96], sizes = [8, 32], strides = [1, 1]} : vector<8x128xf32> to vector<8x32xf32>
    %171 = math.tanh %169 : vector<8x32xf32>
    %172 = arith.mulf %170, %171 : vector<8x32xf32>
    %c2_58 = arith.constant 2 : index
    %c0_59 = arith.constant 0 : index
    %c0_60 = arith.constant 0 : index
    %173 = vector.load %arg21[%c2_58, %c0_59, %c0_60] : memref<8x8x32xf32, #tpu.memory_space<vmem>>, vector<1x8x32xf32>
    %174 = vector.shape_cast %173 : vector<1x8x32xf32> to vector<8x32xf32>
    %175 = vector.shape_cast %172 : vector<8x32xf32> to vector<1x8x32xf32>
    tpu.vector_store %arg21[%c2_58, %c0_59, %c0_60], %175 {strides = array<i32>} : memref<8x8x32xf32, #tpu.memory_space<vmem>>, vector<1x8x32xf32>,
    %c4 = arith.constant 4 : index
    %c0_61 = arith.constant 0 : index
    %c0_62 = arith.constant 0 : index
    %176 = vector.load %arg20[%c4, %c0_61, %c0_62] : memref<8x8x128xf32, #tpu.memory_space<vmem>>, vector<1x8x128xf32>
    %177 = vector.shape_cast %176 : vector<1x8x128xf32> to vector<8x128xf32>
    %178 = arith.truncf %151 : vector<8x32xf32> to vector<8x32xbf16>
    %cst_63 = arith.constant dense<0.000000e+00> : vector<8x128xf32>
    %179 = tpu.matmul %178, %14, %cst_63 {dimension_numbers = #tpu.dot_dimension_numbers<[1], [0], [0], [1], [0, 0, 1, 1], [], []>} : vector<8x32xbf16>, vector<32x128xbf16>, vector<8x128xf32> -> vector<8x128xf32>
    %180 = arith.addf %177, %179 : vector<8x128xf32>
    %181 = arith.negf %180 : vector<8x128xf32>
    %182 = math.exp %181 : vector<8x128xf32>
    %cst_64 = arith.constant 1.000000e+00 : f32
    %183 = vector.broadcast %cst_64 : f32 to vector<8x128xf32>
    %184 = arith.addf %183, %182 : vector<8x128xf32>
    %185 = arith.divf %183, %184 : vector<8x128xf32>
    %186 = vector.extract_strided_slice %180 {offsets = [0, 64], sizes = [8, 32], strides = [1, 1]} : vector<8x128xf32> to vector<8x32xf32>
    %187 = math.tanh %186 : vector<8x32xf32>
    %188 = vector.extract_strided_slice %185 {offsets = [0, 32], sizes = [8, 32], strides = [1, 1]} : vector<8x128xf32> to vector<8x32xf32>
    %189 = arith.mulf %188, %148 : vector<8x32xf32>
    %190 = vector.extract_strided_slice %185 {offsets = [0, 0], sizes = [8, 32], strides = [1, 1]} : vector<8x128xf32> to vector<8x32xf32>
    %191 = arith.mulf %190, %187 : vector<8x32xf32>
    %192 = arith.addf %189, %191 : vector<8x32xf32>
    %193 = vector.extract_strided_slice %185 {offsets = [0, 96], sizes = [8, 32], strides = [1, 1]} : vector<8x128xf32> to vector<8x32xf32>
    %194 = math.tanh %192 : vector<8x32xf32>
    %195 = arith.mulf %193, %194 : vector<8x32xf32>
    %196 = arith.truncf %151 : vector<8x32xf32> to vector<8x32xbf16>
    %cst_65 = arith.constant dense<0.000000e+00> : vector<8x128xf32>
    %197 = tpu.matmul %196, %15, %cst_65 {dimension_numbers = #tpu.dot_dimension_numbers<[1], [0], [0], [1], [0, 0, 1, 1], [], []>} : vector<8x32xbf16>, vector<32x128xbf16>, vector<8x128xf32> -> vector<8x128xf32>
    %198 = arith.truncf %172 : vector<8x32xf32> to vector<8x32xbf16>
    %cst_66 = arith.constant dense<0.000000e+00> : vector<8x128xf32>
    %199 = tpu.matmul %198, %16, %cst_66 {dimension_numbers = #tpu.dot_dimension_numbers<[1], [0], [0], [1], [0, 0, 1, 1], [], []>} : vector<8x32xbf16>, vector<32x128xbf16>, vector<8x128xf32> -> vector<8x128xf32>
    %200 = arith.addf %197, %199 : vector<8x128xf32>
    %201 = arith.addf %200, %19 : vector<8x128xf32>
    %202 = arith.negf %201 : vector<8x128xf32>
    %203 = math.exp %202 : vector<8x128xf32>
    %cst_67 = arith.constant 1.000000e+00 : f32
    %204 = vector.broadcast %cst_67 : f32 to vector<8x128xf32>
    %205 = arith.addf %204, %203 : vector<8x128xf32>
    %206 = arith.divf %204, %205 : vector<8x128xf32>
    %207 = vector.extract_strided_slice %201 {offsets = [0, 64], sizes = [8, 32], strides = [1, 1]} : vector<8x128xf32> to vector<8x32xf32>
    %208 = math.tanh %207 : vector<8x32xf32>
    %209 = vector.extract_strided_slice %206 {offsets = [0, 32], sizes = [8, 32], strides = [1, 1]} : vector<8x128xf32> to vector<8x32xf32>
    %210 = arith.mulf %209, %169 : vector<8x32xf32>
    %211 = vector.extract_strided_slice %206 {offsets = [0, 0], sizes = [8, 32], strides = [1, 1]} : vector<8x128xf32> to vector<8x32xf32>
    %212 = arith.mulf %211, %208 : vector<8x32xf32>
    %213 = arith.addf %210, %212 : vector<8x32xf32>
    %214 = vector.extract_strided_slice %206 {offsets = [0, 96], sizes = [8, 32], strides = [1, 1]} : vector<8x128xf32> to vector<8x32xf32>
    %215 = math.tanh %213 : vector<8x32xf32>
    %216 = arith.mulf %214, %215 : vector<8x32xf32>
    %c3_68 = arith.constant 3 : index
    %c0_69 = arith.constant 0 : index
    %c0_70 = arith.constant 0 : index
    %217 = vector.load %arg21[%c3_68, %c0_69, %c0_70] : memref<8x8x32xf32, #tpu.memory_space<vmem>>, vector<1x8x32xf32>
    %218 = vector.shape_cast %217 : vector<1x8x32xf32> to vector<8x32xf32>
    %219 = vector.shape_cast %216 : vector<8x32xf32> to vector<1x8x32xf32>
    tpu.vector_store %arg21[%c3_68, %c0_69, %c0_70], %219 {strides = array<i32>} : memref<8x8x32xf32, #tpu.memory_space<vmem>>, vector<1x8x32xf32>,
    %c5 = arith.constant 5 : index
    %c0_71 = arith.constant 0 : index
    %c0_72 = arith.constant 0 : index
    %220 = vector.load %arg20[%c5, %c0_71, %c0_72] : memref<8x8x128xf32, #tpu.memory_space<vmem>>, vector<1x8x128xf32>
    %221 = vector.shape_cast %220 : vector<1x8x128xf32> to vector<8x128xf32>
    %222 = arith.truncf %195 : vector<8x32xf32> to vector<8x32xbf16>
    %cst_73 = arith.constant dense<0.000000e+00> : vector<8x128xf32>
    %223 = tpu.matmul %222, %14, %cst_73 {dimension_numbers = #tpu.dot_dimension_numbers<[1], [0], [0], [1], [0, 0, 1, 1], [], []>} : vector<8x32xbf16>, vector<32x128xbf16>, vector<8x128xf32> -> vector<8x128xf32>
    %224 = arith.addf %221, %223 : vector<8x128xf32>
    %225 = arith.negf %224 : vector<8x128xf32>
    %226 = math.exp %225 : vector<8x128xf32>
    %cst_74 = arith.constant 1.000000e+00 : f32
    %227 = vector.broadcast %cst_74 : f32 to vector<8x128xf32>
    %228 = arith.addf %227, %226 : vector<8x128xf32>
    %229 = arith.divf %227, %228 : vector<8x128xf32>
    %230 = vector.extract_strided_slice %224 {offsets = [0, 64], sizes = [8, 32], strides = [1, 1]} : vector<8x128xf32> to vector<8x32xf32>
    %231 = math.tanh %230 : vector<8x32xf32>
    %232 = vector.extract_strided_slice %229 {offsets = [0, 32], sizes = [8, 32], strides = [1, 1]} : vector<8x128xf32> to vector<8x32xf32>
    %233 = arith.mulf %232, %192 : vector<8x32xf32>
    %234 = vector.extract_strided_slice %229 {offsets = [0, 0], sizes = [8, 32], strides = [1, 1]} : vector<8x128xf32> to vector<8x32xf32>
    %235 = arith.mulf %234, %231 : vector<8x32xf32>
    %236 = arith.addf %233, %235 : vector<8x32xf32>
    %237 = vector.extract_strided_slice %229 {offsets = [0, 96], sizes = [8, 32], strides = [1, 1]} : vector<8x128xf32> to vector<8x32xf32>
    %238 = math.tanh %236 : vector<8x32xf32>
    %239 = arith.mulf %237, %238 : vector<8x32xf32>
    %240 = arith.truncf %195 : vector<8x32xf32> to vector<8x32xbf16>
    %cst_75 = arith.constant dense<0.000000e+00> : vector<8x128xf32>
    %241 = tpu.matmul %240, %15, %cst_75 {dimension_numbers = #tpu.dot_dimension_numbers<[1], [0], [0], [1], [0, 0, 1, 1], [], []>} : vector<8x32xbf16>, vector<32x128xbf16>, vector<8x128xf32> -> vector<8x128xf32>
    %242 = arith.truncf %216 : vector<8x32xf32> to vector<8x32xbf16>
    %cst_76 = arith.constant dense<0.000000e+00> : vector<8x128xf32>
    %243 = tpu.matmul %242, %16, %cst_76 {dimension_numbers = #tpu.dot_dimension_numbers<[1], [0], [0], [1], [0, 0, 1, 1], [], []>} : vector<8x32xbf16>, vector<32x128xbf16>, vector<8x128xf32> -> vector<8x128xf32>
    %244 = arith.addf %241, %243 : vector<8x128xf32>
    %245 = arith.addf %244, %19 : vector<8x128xf32>
    %246 = arith.negf %245 : vector<8x128xf32>
    %247 = math.exp %246 : vector<8x128xf32>
    %cst_77 = arith.constant 1.000000e+00 : f32
    %248 = vector.broadcast %cst_77 : f32 to vector<8x128xf32>
    %249 = arith.addf %248, %247 : vector<8x128xf32>
    %250 = arith.divf %248, %249 : vector<8x128xf32>
    %251 = vector.extract_strided_slice %245 {offsets = [0, 64], sizes = [8, 32], strides = [1, 1]} : vector<8x128xf32> to vector<8x32xf32>
    %252 = math.tanh %251 : vector<8x32xf32>
    %253 = vector.extract_strided_slice %250 {offsets = [0, 32], sizes = [8, 32], strides = [1, 1]} : vector<8x128xf32> to vector<8x32xf32>
    %254 = arith.mulf %253, %213 : vector<8x32xf32>
    %255 = vector.extract_strided_slice %250 {offsets = [0, 0], sizes = [8, 32], strides = [1, 1]} : vector<8x128xf32> to vector<8x32xf32>
    %256 = arith.mulf %255, %252 : vector<8x32xf32>
    %257 = arith.addf %254, %256 : vector<8x32xf32>
    %258 = vector.extract_strided_slice %250 {offsets = [0, 96], sizes = [8, 32], strides = [1, 1]} : vector<8x128xf32> to vector<8x32xf32>
    %259 = math.tanh %257 : vector<8x32xf32>
    %260 = arith.mulf %258, %259 : vector<8x32xf32>
    %c4_78 = arith.constant 4 : index
    %c0_79 = arith.constant 0 : index
    %c0_80 = arith.constant 0 : index
    %261 = vector.load %arg21[%c4_78, %c0_79, %c0_80] : memref<8x8x32xf32, #tpu.memory_space<vmem>>, vector<1x8x32xf32>
    %262 = vector.shape_cast %261 : vector<1x8x32xf32> to vector<8x32xf32>
    %263 = vector.shape_cast %260 : vector<8x32xf32> to vector<1x8x32xf32>
    tpu.vector_store %arg21[%c4_78, %c0_79, %c0_80], %263 {strides = array<i32>} : memref<8x8x32xf32, #tpu.memory_space<vmem>>, vector<1x8x32xf32>,
    %c6 = arith.constant 6 : index
    %c0_81 = arith.constant 0 : index
    %c0_82 = arith.constant 0 : index
    %264 = vector.load %arg20[%c6, %c0_81, %c0_82] : memref<8x8x128xf32, #tpu.memory_space<vmem>>, vector<1x8x128xf32>
    %265 = vector.shape_cast %264 : vector<1x8x128xf32> to vector<8x128xf32>
    %266 = arith.truncf %239 : vector<8x32xf32> to vector<8x32xbf16>
    %cst_83 = arith.constant dense<0.000000e+00> : vector<8x128xf32>
    %267 = tpu.matmul %266, %14, %cst_83 {dimension_numbers = #tpu.dot_dimension_numbers<[1], [0], [0], [1], [0, 0, 1, 1], [], []>} : vector<8x32xbf16>, vector<32x128xbf16>, vector<8x128xf32> -> vector<8x128xf32>
    %268 = arith.addf %265, %267 : vector<8x128xf32>
    %269 = arith.negf %268 : vector<8x128xf32>
    %270 = math.exp %269 : vector<8x128xf32>
    %cst_84 = arith.constant 1.000000e+00 : f32
    %271 = vector.broadcast %cst_84 : f32 to vector<8x128xf32>
    %272 = arith.addf %271, %270 : vector<8x128xf32>
    %273 = arith.divf %271, %272 : vector<8x128xf32>
    %274 = vector.extract_strided_slice %268 {offsets = [0, 64], sizes = [8, 32], strides = [1, 1]} : vector<8x128xf32> to vector<8x32xf32>
    %275 = math.tanh %274 : vector<8x32xf32>
    %276 = vector.extract_strided_slice %273 {offsets = [0, 32], sizes = [8, 32], strides = [1, 1]} : vector<8x128xf32> to vector<8x32xf32>
    %277 = arith.mulf %276, %236 : vector<8x32xf32>
    %278 = vector.extract_strided_slice %273 {offsets = [0, 0], sizes = [8, 32], strides = [1, 1]} : vector<8x128xf32> to vector<8x32xf32>
    %279 = arith.mulf %278, %275 : vector<8x32xf32>
    %280 = arith.addf %277, %279 : vector<8x32xf32>
    %281 = vector.extract_strided_slice %273 {offsets = [0, 96], sizes = [8, 32], strides = [1, 1]} : vector<8x128xf32> to vector<8x32xf32>
    %282 = math.tanh %280 : vector<8x32xf32>
    %283 = arith.mulf %281, %282 : vector<8x32xf32>
    %284 = arith.truncf %239 : vector<8x32xf32> to vector<8x32xbf16>
    %cst_85 = arith.constant dense<0.000000e+00> : vector<8x128xf32>
    %285 = tpu.matmul %284, %15, %cst_85 {dimension_numbers = #tpu.dot_dimension_numbers<[1], [0], [0], [1], [0, 0, 1, 1], [], []>} : vector<8x32xbf16>, vector<32x128xbf16>, vector<8x128xf32> -> vector<8x128xf32>
    %286 = arith.truncf %260 : vector<8x32xf32> to vector<8x32xbf16>
    %cst_86 = arith.constant dense<0.000000e+00> : vector<8x128xf32>
    %287 = tpu.matmul %286, %16, %cst_86 {dimension_numbers = #tpu.dot_dimension_numbers<[1], [0], [0], [1], [0, 0, 1, 1], [], []>} : vector<8x32xbf16>, vector<32x128xbf16>, vector<8x128xf32> -> vector<8x128xf32>
    %288 = arith.addf %285, %287 : vector<8x128xf32>
    %289 = arith.addf %288, %19 : vector<8x128xf32>
    %290 = arith.negf %289 : vector<8x128xf32>
    %291 = math.exp %290 : vector<8x128xf32>
    %cst_87 = arith.constant 1.000000e+00 : f32
    %292 = vector.broadcast %cst_87 : f32 to vector<8x128xf32>
    %293 = arith.addf %292, %291 : vector<8x128xf32>
    %294 = arith.divf %292, %293 : vector<8x128xf32>
    %295 = vector.extract_strided_slice %289 {offsets = [0, 64], sizes = [8, 32], strides = [1, 1]} : vector<8x128xf32> to vector<8x32xf32>
    %296 = math.tanh %295 : vector<8x32xf32>
    %297 = vector.extract_strided_slice %294 {offsets = [0, 32], sizes = [8, 32], strides = [1, 1]} : vector<8x128xf32> to vector<8x32xf32>
    %298 = arith.mulf %297, %257 : vector<8x32xf32>
    %299 = vector.extract_strided_slice %294 {offsets = [0, 0], sizes = [8, 32], strides = [1, 1]} : vector<8x128xf32> to vector<8x32xf32>
    %300 = arith.mulf %299, %296 : vector<8x32xf32>
    %301 = arith.addf %298, %300 : vector<8x32xf32>
    %302 = vector.extract_strided_slice %294 {offsets = [0, 96], sizes = [8, 32], strides = [1, 1]} : vector<8x128xf32> to vector<8x32xf32>
    %303 = math.tanh %301 : vector<8x32xf32>
    %304 = arith.mulf %302, %303 : vector<8x32xf32>
    %c5_88 = arith.constant 5 : index
    %c0_89 = arith.constant 0 : index
    %c0_90 = arith.constant 0 : index
    %305 = vector.load %arg21[%c5_88, %c0_89, %c0_90] : memref<8x8x32xf32, #tpu.memory_space<vmem>>, vector<1x8x32xf32>
    %306 = vector.shape_cast %305 : vector<1x8x32xf32> to vector<8x32xf32>
    %307 = vector.shape_cast %304 : vector<8x32xf32> to vector<1x8x32xf32>
    tpu.vector_store %arg21[%c5_88, %c0_89, %c0_90], %307 {strides = array<i32>} : memref<8x8x32xf32, #tpu.memory_space<vmem>>, vector<1x8x32xf32>,
    %c7 = arith.constant 7 : index
    %c0_91 = arith.constant 0 : index
    %c0_92 = arith.constant 0 : index
    %308 = vector.load %arg20[%c7, %c0_91, %c0_92] : memref<8x8x128xf32, #tpu.memory_space<vmem>>, vector<1x8x128xf32>
    %309 = vector.shape_cast %308 : vector<1x8x128xf32> to vector<8x128xf32>
    %310 = arith.truncf %283 : vector<8x32xf32> to vector<8x32xbf16>
    %cst_93 = arith.constant dense<0.000000e+00> : vector<8x128xf32>
    %311 = tpu.matmul %310, %14, %cst_93 {dimension_numbers = #tpu.dot_dimension_numbers<[1], [0], [0], [1], [0, 0, 1, 1], [], []>} : vector<8x32xbf16>, vector<32x128xbf16>, vector<8x128xf32> -> vector<8x128xf32>
    %312 = arith.addf %309, %311 : vector<8x128xf32>
    %313 = arith.negf %312 : vector<8x128xf32>
    %314 = math.exp %313 : vector<8x128xf32>
    %cst_94 = arith.constant 1.000000e+00 : f32
    %315 = vector.broadcast %cst_94 : f32 to vector<8x128xf32>
    %316 = arith.addf %315, %314 : vector<8x128xf32>
    %317 = arith.divf %315, %316 : vector<8x128xf32>
    %318 = vector.extract_strided_slice %312 {offsets = [0, 64], sizes = [8, 32], strides = [1, 1]} : vector<8x128xf32> to vector<8x32xf32>
    %319 = math.tanh %318 : vector<8x32xf32>
    %320 = vector.extract_strided_slice %317 {offsets = [0, 32], sizes = [8, 32], strides = [1, 1]} : vector<8x128xf32> to vector<8x32xf32>
    %321 = arith.mulf %320, %280 : vector<8x32xf32>
    %322 = vector.extract_strided_slice %317 {offsets = [0, 0], sizes = [8, 32], strides = [1, 1]} : vector<8x128xf32> to vector<8x32xf32>
    %323 = arith.mulf %322, %319 : vector<8x32xf32>
    %324 = arith.addf %321, %323 : vector<8x32xf32>
    %325 = vector.extract_strided_slice %317 {offsets = [0, 96], sizes = [8, 32], strides = [1, 1]} : vector<8x128xf32> to vector<8x32xf32>
    %326 = math.tanh %324 : vector<8x32xf32>
    %327 = arith.mulf %325, %326 : vector<8x32xf32>
    %328 = arith.truncf %283 : vector<8x32xf32> to vector<8x32xbf16>
    %cst_95 = arith.constant dense<0.000000e+00> : vector<8x128xf32>
    %329 = tpu.matmul %328, %15, %cst_95 {dimension_numbers = #tpu.dot_dimension_numbers<[1], [0], [0], [1], [0, 0, 1, 1], [], []>} : vector<8x32xbf16>, vector<32x128xbf16>, vector<8x128xf32> -> vector<8x128xf32>
    %330 = arith.truncf %304 : vector<8x32xf32> to vector<8x32xbf16>
    %cst_96 = arith.constant dense<0.000000e+00> : vector<8x128xf32>
    %331 = tpu.matmul %330, %16, %cst_96 {dimension_numbers = #tpu.dot_dimension_numbers<[1], [0], [0], [1], [0, 0, 1, 1], [], []>} : vector<8x32xbf16>, vector<32x128xbf16>, vector<8x128xf32> -> vector<8x128xf32>
    %332 = arith.addf %329, %331 : vector<8x128xf32>
    %333 = arith.addf %332, %19 : vector<8x128xf32>
    %334 = arith.negf %333 : vector<8x128xf32>
    %335 = math.exp %334 : vector<8x128xf32>
    %cst_97 = arith.constant 1.000000e+00 : f32
    %336 = vector.broadcast %cst_97 : f32 to vector<8x128xf32>
    %337 = arith.addf %336, %335 : vector<8x128xf32>
    %338 = arith.divf %336, %337 : vector<8x128xf32>
    %339 = vector.extract_strided_slice %333 {offsets = [0, 64], sizes = [8, 32], strides = [1, 1]} : vector<8x128xf32> to vector<8x32xf32>
    %340 = math.tanh %339 : vector<8x32xf32>
    %341 = vector.extract_strided_slice %338 {offsets = [0, 32], sizes = [8, 32], strides = [1, 1]} : vector<8x128xf32> to vector<8x32xf32>
    %342 = arith.mulf %341, %301 : vector<8x32xf32>
    %343 = vector.extract_strided_slice %338 {offsets = [0, 0], sizes = [8, 32], strides = [1, 1]} : vector<8x128xf32> to vector<8x32xf32>
    %344 = arith.mulf %343, %340 : vector<8x32xf32>
    %345 = arith.addf %342, %344 : vector<8x32xf32>
    %346 = vector.extract_strided_slice %338 {offsets = [0, 96], sizes = [8, 32], strides = [1, 1]} : vector<8x128xf32> to vector<8x32xf32>
    %347 = math.tanh %345 : vector<8x32xf32>
    %348 = arith.mulf %346, %347 : vector<8x32xf32>
    %c6_98 = arith.constant 6 : index
    %c0_99 = arith.constant 0 : index
    %c0_100 = arith.constant 0 : index
    %349 = vector.load %arg21[%c6_98, %c0_99, %c0_100] : memref<8x8x32xf32, #tpu.memory_space<vmem>>, vector<1x8x32xf32>
    %350 = vector.shape_cast %349 : vector<1x8x32xf32> to vector<8x32xf32>
    %351 = vector.shape_cast %348 : vector<8x32xf32> to vector<1x8x32xf32>
    tpu.vector_store %arg21[%c6_98, %c0_99, %c0_100], %351 {strides = array<i32>} : memref<8x8x32xf32, #tpu.memory_space<vmem>>, vector<1x8x32xf32>,
    %352 = arith.truncf %327 : vector<8x32xf32> to vector<8x32xbf16>
    %cst_101 = arith.constant dense<0.000000e+00> : vector<8x128xf32>
    %353 = tpu.matmul %352, %15, %cst_101 {dimension_numbers = #tpu.dot_dimension_numbers<[1], [0], [0], [1], [0, 0, 1, 1], [], []>} : vector<8x32xbf16>, vector<32x128xbf16>, vector<8x128xf32> -> vector<8x128xf32>
    %354 = arith.truncf %348 : vector<8x32xf32> to vector<8x32xbf16>
    %cst_102 = arith.constant dense<0.000000e+00> : vector<8x128xf32>
    %355 = tpu.matmul %354, %16, %cst_102 {dimension_numbers = #tpu.dot_dimension_numbers<[1], [0], [0], [1], [0, 0, 1, 1], [], []>} : vector<8x32xbf16>, vector<32x128xbf16>, vector<8x128xf32> -> vector<8x128xf32>
    %356 = arith.addf %353, %355 : vector<8x128xf32>
    %357 = arith.addf %356, %19 : vector<8x128xf32>
    %358 = arith.negf %357 : vector<8x128xf32>
    %359 = math.exp %358 : vector<8x128xf32>
    %cst_103 = arith.constant 1.000000e+00 : f32
    %360 = vector.broadcast %cst_103 : f32 to vector<8x128xf32>
    %361 = arith.addf %360, %359 : vector<8x128xf32>
    %362 = arith.divf %360, %361 : vector<8x128xf32>
    %363 = vector.extract_strided_slice %357 {offsets = [0, 64], sizes = [8, 32], strides = [1, 1]} : vector<8x128xf32> to vector<8x32xf32>
    %364 = math.tanh %363 : vector<8x32xf32>
    %365 = vector.extract_strided_slice %362 {offsets = [0, 32], sizes = [8, 32], strides = [1, 1]} : vector<8x128xf32> to vector<8x32xf32>
    %366 = arith.mulf %365, %345 : vector<8x32xf32>
    %367 = vector.extract_strided_slice %362 {offsets = [0, 0], sizes = [8, 32], strides = [1, 1]} : vector<8x128xf32> to vector<8x32xf32>
    %368 = arith.mulf %367, %364 : vector<8x32xf32>
    %369 = arith.addf %366, %368 : vector<8x32xf32>
    %370 = vector.extract_strided_slice %362 {offsets = [0, 96], sizes = [8, 32], strides = [1, 1]} : vector<8x128xf32> to vector<8x32xf32>
    %371 = math.tanh %369 : vector<8x32xf32>
    %372 = arith.mulf %370, %371 : vector<8x32xf32>
    %c7_104 = arith.constant 7 : index
    %c0_105 = arith.constant 0 : index
    %c0_106 = arith.constant 0 : index
    %373 = vector.load %arg21[%c7_104, %c0_105, %c0_106] : memref<8x8x32xf32, #tpu.memory_space<vmem>>, vector<1x8x32xf32>
    %374 = vector.shape_cast %373 : vector<1x8x32xf32> to vector<8x32xf32>
    %375 = vector.shape_cast %372 : vector<8x32xf32> to vector<1x8x32xf32>
    tpu.vector_store %arg21[%c7_104, %c0_105, %c0_106], %375 {strides = array<i32>} : memref<8x8x32xf32, #tpu.memory_space<vmem>>, vector<1x8x32xf32>,
    %c0_107 = arith.constant 0 : index
    %c0_108 = arith.constant 0 : index
    %376 = vector.load %arg16[%c0_107, %c0_108] : memref<8x32xf32, #tpu.memory_space<vmem>>, vector<8x32xf32>
    tpu.vector_store %arg16[%c0_107, %c0_108], %327 {strides = array<i32>} : memref<8x32xf32, #tpu.memory_space<vmem>>, vector<8x32xf32>,
    %c0_109 = arith.constant 0 : index
    %c0_110 = arith.constant 0 : index
    %377 = vector.load %arg17[%c0_109, %c0_110] : memref<8x32xf32, #tpu.memory_space<vmem>>, vector<8x32xf32>
    tpu.vector_store %arg17[%c0_109, %c0_110], %324 {strides = array<i32>} : memref<8x32xf32, #tpu.memory_space<vmem>>, vector<8x32xf32>,
    %c0_111 = arith.constant 0 : index
    %c0_112 = arith.constant 0 : index
    %378 = vector.load %arg18[%c0_111, %c0_112] : memref<8x32xf32, #tpu.memory_space<vmem>>, vector<8x32xf32>
    tpu.vector_store %arg18[%c0_111, %c0_112], %372 {strides = array<i32>} : memref<8x32xf32, #tpu.memory_space<vmem>>, vector<8x32xf32>,
    %c0_113 = arith.constant 0 : index
    %c0_114 = arith.constant 0 : index
    %379 = vector.load %arg19[%c0_113, %c0_114] : memref<8x32xf32, #tpu.memory_space<vmem>>, vector<8x32xf32>
    tpu.vector_store %arg19[%c0_113, %c0_114], %369 {strides = array<i32>} : memref<8x32xf32, #tpu.memory_space<vmem>>, vector<8x32xf32>,
    %c0_115 = arith.constant 0 : index
    %c0_116 = arith.constant 0 : index
    %c0_117 = arith.constant 0 : index
    %380 = vector.load %arg21[%c0_115, %c0_116, %c0_117] : memref<8x8x32xf32, #tpu.memory_space<vmem>>, vector<8x8x32xf32>
    %c0_118 = arith.constant 0 : index
    %c0_119 = arith.constant 0 : index
    %c0_120 = arith.constant 0 : index
    %381 = vector.load %arg4[%c0_118, %c0_119, %c0_120] : memref<8x8x1xf32, #tpu.memory_space<vmem>>, vector<8x8x1xf32>
    %382 = vector.broadcast %381 : vector<8x8x1xf32> to vector<8x8x32xf32>
    %383 = arith.mulf %380, %382 : vector<8x8x32xf32>
    %384 = arith.truncf %383 : vector<8x8x32xf32> to vector<8x8x32xbf16>
    %385 = vector.shape_cast %384 : vector<8x8x32xbf16> to vector<64x32xbf16>
    %c0_121 = arith.constant 0 : index
    %c0_122 = arith.constant 0 : index
    %386 = vector.load %arg12[%c0_121, %c0_122] : memref<32x256xbf16, #tpu.memory_space<vmem>>, vector<32x256xbf16>
    %cst_123 = arith.constant dense<0.000000e+00> : vector<64x256xf32>
    %387 = tpu.matmul %385, %386, %cst_123 {dimension_numbers = #tpu.dot_dimension_numbers<[1], [0], [0], [1], [0, 0, 1, 1], [], []>} : vector<64x32xbf16>, vector<32x256xbf16>, vector<64x256xf32> -> vector<64x256xf32>
    %388 = vector.shape_cast %387 : vector<64x256xf32> to vector<8x8x256xf32>
    %c0_124 = arith.constant 0 : index
    %c0_125 = arith.constant 0 : index
    %389 = vector.load %arg13[%c0_124, %c0_125] : memref<1x256xf32, #tpu.memory_space<vmem>>, vector<1x256xf32>
    %390 = vector.shape_cast %389 : vector<1x256xf32> to vector<1x1x256xf32>
    %391 = vector.broadcast %390 : vector<1x1x256xf32> to vector<8x8x256xf32>
    %392 = arith.addf %388, %391 : vector<8x8x256xf32>
    %c0_126 = arith.constant 0 : index
    %c0_127 = arith.constant 0 : index
    %c0_128 = arith.constant 0 : index
    %393 = vector.load %arg14[%c0_126, %c0_127, %c0_128] : memref<8x8x256xf32, #tpu.memory_space<vmem>>, vector<8x8x256xf32>
    tpu.vector_store %arg14[%c0_126, %c0_127, %c0_128], %392 {strides = array<i32>} : memref<8x8x256xf32, #tpu.memory_space<vmem>>, vector<8x8x256xf32>,
    return
  }
  func.func @transform_0(%arg0: i32, %arg1: i32) -> (i32, i32) {
    %c0_i32 = arith.constant 0 : i32
    %c0_i32_0 = arith.constant 0 : i32
    return %arg0, %c0_i32 : i32, i32
  }
  func.func @transform_1(%arg0: i32, %arg1: i32) -> (i32, i32, i32) {
    %c0_i32 = arith.constant 0 : i32
    %c0_i32_0 = arith.constant 0 : i32
    return %arg1, %arg0, %c0_i32 : i32, i32, i32
  }
  func.func @transform_2(%arg0: i32, %arg1: i32) -> (i32, i32, i32) {
    %c0_i32 = arith.constant 0 : i32
    %c0_i32_0 = arith.constant 0 : i32
    return %arg1, %arg0, %c0_i32 : i32, i32, i32
  }
  func.func @transform_3(%arg0: i32, %arg1: i32) -> (i32, i32) {
    %c0_i32 = arith.constant 0 : i32
    %c0_i32_0 = arith.constant 0 : i32
    %c0_i32_1 = arith.constant 0 : i32
    return %c0_i32, %c0_i32_0 : i32, i32
  }
  func.func @transform_4(%arg0: i32, %arg1: i32) -> (i32, i32) {
    %c0_i32 = arith.constant 0 : i32
    %c0_i32_0 = arith.constant 0 : i32
    %c0_i32_1 = arith.constant 0 : i32
    return %c0_i32, %c0_i32_0 : i32, i32
  }
  func.func @transform_5(%arg0: i32, %arg1: i32) -> (i32, i32) {
    %c0_i32 = arith.constant 0 : i32
    %c0_i32_0 = arith.constant 0 : i32
    %c0_i32_1 = arith.constant 0 : i32
    return %c0_i32, %c0_i32_0 : i32, i32
  }
  func.func @transform_6(%arg0: i32, %arg1: i32) -> (i32, i32) {
    %c0_i32 = arith.constant 0 : i32
    %c0_i32_0 = arith.constant 0 : i32
    %c0_i32_1 = arith.constant 0 : i32
    return %c0_i32, %c0_i32_0 : i32, i32
  }
  func.func @transform_7(%arg0: i32, %arg1: i32) -> (i32, i32) {
    %c0_i32 = arith.constant 0 : i32
    %c0_i32_0 = arith.constant 0 : i32
    %c0_i32_1 = arith.constant 0 : i32
    return %c0_i32, %c0_i32_0 : i32, i32
  }
  func.func @transform_8(%arg0: i32, %arg1: i32) -> (i32, i32) {
    %c0_i32 = arith.constant 0 : i32
    %c0_i32_0 = arith.constant 0 : i32
    %c0_i32_1 = arith.constant 0 : i32
    return %c0_i32, %c0_i32_0 : i32, i32
  }
  func.func @transform_9(%arg0: i32, %arg1: i32) -> (i32, i32) {
    %c0_i32 = arith.constant 0 : i32
    %c0_i32_0 = arith.constant 0 : i32
    %c0_i32_1 = arith.constant 0 : i32
    return %c0_i32, %c0_i32_0 : i32, i32
  }
  func.func @transform_10(%arg0: i32, %arg1: i32) -> (i32, i32) {
    %c0_i32 = arith.constant 0 : i32
    %c0_i32_0 = arith.constant 0 : i32
    %c0_i32_1 = arith.constant 0 : i32
    return %c0_i32, %c0_i32_0 : i32, i32
  }
  func.func @transform_11(%arg0: i32, %arg1: i32) -> (i32, i32) {
    %c0_i32 = arith.constant 0 : i32
    %c0_i32_0 = arith.constant 0 : i32
    %c0_i32_1 = arith.constant 0 : i32
    return %c0_i32, %c0_i32_0 : i32, i32
  }
  func.func @transform_12(%arg0: i32, %arg1: i32) -> (i32, i32, i32) {
    %c0_i32 = arith.constant 0 : i32
    %c0_i32_0 = arith.constant 0 : i32
    return %arg1, %arg0, %c0_i32 : i32, i32, i32
  }
}

</mosaic_0001>

<bundles_post_ra>
// kernel: tpu_custom_call.1
= control target key start
LH: loop header
LB: loop body
LE: loop exit
PB: predicated region body
PF: predicated region fallthrough
CT: control target
= control target key end

     0   :  { %17 = vsyncpa [#allocation10], 0  ;;  %s2726_s0 = inlined_call_operand.hbm [shape: f32[8,136], index: 0, kind: input, shape index: {}]   ;;  %s2727_s1 = inlined_call_operand.vmem [shape: f32[8,8,32], index: 1, kind: input, shape index: {}]   ;;  %s2728_s2 = inlined_call_operand.vmem [shape: f32[8,8,1], index: 2, kind: input, shape index: {}]   ;;  %s2729_s3 = inlined_call_operand.hbm [shape: f32[136,128], index: 3, kind: input, shape index: {}]   ;;  %s2730_s4 = inlined_call_operand.hbm [shape: bf16[32,128], index: 4, kind: input, shape index: {}]   ;;  %s2731_s5 = inlined_call_operand.hbm [shape: bf16[32,128], index: 5, kind: input, shape index: {}]   ;;  %s2732_s6 = inlined_call_operand.vmem [shape: f32[1,128], index: 6, kind: input, shape index: {}]   ;;  %s2733_s7 = inlined_call_operand.hbm [shape: bf16[32,128], index: 7, kind: input, shape index: {}]   ;;  %s2734_s8 = inlined_call_operand.hbm [shape: bf16[32,128], index: 8, kind: input, shape index: {}]   ;;  %s2735_s9 = inlined_call_operand.vmem [shape: f32[1,128], index: 9, kind: input, shape index: {}]   ;;  %s2736_s10 = inlined_call_operand.hbm [shape: bf16[32,256], index: 10, kind: input, shape index: {}]   ;;  %s2737_s11 = inlined_call_operand.vmem [shape: f32[1,256], index: 11, kind: input, shape index: {}]   ;;  %s2738_s12 = inlined_call_operand.hbm [shape: f32[8,8,256], index: 12, kind: output, shape index: {}]  }
   0x1   :  { %18 = vsyncpa [#allocation13], 0 }
   0x2   :  { %19 = vsyncpa [#allocation16], 0 }
   0x3   :  { %20 = vsyncpa [#allocation19], 0  ;;  %s41_s23 = sshll.u32 %s2729_s3, 4  ;;  %s42_s23 = int_to_ptr.hbm [resolvable:$true] %s41_s23 }
   0x4   :  { %21 = vsyncpa [#allocation11], 0  ;;  %s2202_s24 = smov [#allocation12]   ;;  %s2203_s26 = smov 128  }
   0x5   :  { %s43_s25 = sshll.u32 %s2202_s24, 4  ;;  %s2204_s27 = smov 8   ;;  %s44_s25 = int_to_ptr.vmem [resolvable:$true] %s43_s25 }
   0x6   :  { %49 = dma.hbm_to_vmem [thread:$0]  %s42_s23, 2176, %s44_s25, [#allocation13], %s2203_s26, %s2203_s26, %s2204_s27  }
   0x7   :  { %s67_s30 = sshll.u32 %s2731_s5, 4  ;;  %s2205_s13 = smov [#allocation15]   ;;  %s68_s30 = int_to_ptr.hbm [resolvable:$true] %s67_s30 }
   0x8   :  { %s69_s14 = sshll.u32 %s2205_s13, 4  ;;  %s95_s16 = sshll.u32 %s2734_s8, 4  ;;  %s70_s14 = int_to_ptr.vmem [resolvable:$true] %s69_s14  ;;  %s96_s16 = int_to_ptr.hbm [resolvable:$true] %s95_s16 }
   0x9   :  { %s2206_s17 = smov 64   ;;  %s2207_s18 = smov 4  }
   0xa   :  { %75 = dma.hbm_to_vmem [thread:$0]  %s68_s30, 256, %s70_s14, [#allocation16], %s2206_s17, %s2206_s17, %s2207_s18  }
   0xb   :  { %s27_s21 = sshll.u32 %s2726_s0, 4  ;;  %s2208_s22 = smov [#allocation18]   ;;  %s28_s21 = int_to_ptr.hbm [resolvable:$true] %s27_s21 }
   0xc   :  { %s97_s5 = sshll.u32 %s2208_s22, 4  ;;  %s2209_s23 = smov [#allocation9]   ;;  %s98_s5 = int_to_ptr.vmem [resolvable:$true] %s97_s5 }
   0xd   :  { %103 = dma.hbm_to_vmem [thread:$0]  %s96_s16, 256, %s98_s5, [#allocation19], %s2206_s17, %s2206_s17, %s2207_s18  }
   0xe   :  { %s29_s8 = sshll.u32 %s2209_s23, 4  ;;  %s54_s28 = sshll.u32 %s2730_s4, 4  ;;  %s30_s8 = int_to_ptr.vmem [resolvable:$true] %s29_s8  ;;  %s55_s28 = int_to_ptr.hbm [resolvable:$true] %s54_s28 }
   0xf   :  { %32 = dma.hbm_to_vmem [thread:$0]  %s28_s21, 256, %s30_s8, [#allocation10]  }
  0x10   :  { %s82_s0 = sshll.u32 %s2733_s7, 4  ;;  %s2210_s13 = smov [#allocation14]   ;;  %s83_s0 = int_to_ptr.hbm [resolvable:$true] %s82_s0 }
  0x11   :  { %s56_s14 = sshll.u32 %s2210_s13, 4  ;;  %s2211_s15 = smov [#allocation17]   ;;  %s57_s14 = int_to_ptr.vmem [resolvable:$true] %s56_s14 }
  0x12   :  { %62 = dma.hbm_to_vmem [thread:$0]  %s55_s28, 256, %s57_s14, [#allocation13], %s2206_s17, %s2206_s17, %s2207_s18  }
  0x13   :  { %s84_s3 = sshll.u32 %s2211_s15, 4  ;;  %s110_s4 = sshll.u32 %s2736_s10, 4  ;;  %s85_s3 = int_to_ptr.vmem [resolvable:$true] %s84_s3  ;;  %s111_s4 = int_to_ptr.hbm [resolvable:$true] %s110_s4 }
  0x14   :  { %90 = dma.hbm_to_vmem [thread:$0]  %s83_s0, 256, %s85_s3, [#allocation16], %s2206_s17, %s2206_s17, %s2207_s18  }
  0x15   :  { %s2212_s20 = smov [#allocation20]  }
  0x16   :  { %s112_s7 = sshll.u32 %s2212_s20, 4  ;;  %s113_s7 = int_to_ptr.vmem [resolvable:$true] %s112_s7 }
  0x17   :  { %118 = dma.hbm_to_vmem [thread:$0]  %s111_s4, 512, %s113_s7, [#allocation19], %s2203_s26, %s2203_s26, %s2204_s27  }
  0x18   :  { %2192 = dma.done.wait [#allocation10], 256  }
  0x19   :  { %2193 = vsyncadd [#allocation10], 4294967040 }
  0x1a   :  { %2194 = dma.done.wait [#allocation13], 2432  }
  0x1b   :  { %2195 = vsyncadd [#allocation13], 4294964864 }
  0x1c   :  { %2196 = dma.done.wait [#allocation16], 512  }
  0x1d   :  { %2197 = vsyncadd [#allocation16], 4294966784 }
  0x1e   :  { %2198 = dma.done.wait [#allocation19], 768  }
  0x1f   :  { %2199 = vsyncadd [#allocation19], 4294966528  ;;  %v176_v0 = vld [vmem:[#allocation12 + $0x78] sm:$0xff]  ;;  %v175_v1 = vld [vmem:[#allocation12 + $0x70] sm:$0xff]  ;;  %vm154_vm0 = vcmask 261120   ;;  %v2213_v25 = vmov 0.0  }
  0x20   :  { %v1837_v2 = vld [vmem:[#allocation14 + $0x8] sm:$0xff]  ;;  %186 = vmatpush.msra.mxu0 %v176_v0  ;;  %v174_v3 = vld [vmem:[#allocation12 + $0x68] sm:$0xff]  ;;  %v228_v6 = vld [vmem:[%s2727_s1 + $0x8] sm:$0xff]  ;;  %155 = vst.msk [vmem:[#allocation3] sm:$0xff] %vm154_vm0, %v2213_v25  ;;  %vm182_vm1 = vcmask 64512   ;;  %s2216_s8 = smov 96  }
  0x21   :  { %274 = vmatpush.bf16.msra.mxu2 %v1837_v2  ;;  %v1836_v4 = vld [vmem:[#allocation14] sm:$0xff]  ;;  %v227_v5 = vld [vmem:[%s2727_s1] sm:$0xff]  ;;  %v2326_v7 = vld [vmem:[#allocation15 + $0x8] sm:$0xff]  ;;  %156 = vst.msk [vmem:[#allocation4] sm:$0xff] %vm154_vm0, %v2213_v25  ;;  %s1719_s14 = sshll.u32 %s2738_s12, 4  ;;  %s2218_s15 = smov 256   ;;  %s1720_s14 = int_to_ptr.hbm [resolvable:$true] %s1719_s14 }
  0x22   :  { %187 = vmatpush.msra.mxu0 %v175_v1  ;;  %v173_v8 = vld [vmem:[#allocation12 + $0x60] sm:$0xff]  ;;  %v235_v9 = vpack.c.bf16 %v228_v6, %v227_v5  ;;  %v172_v10 = vld [vmem:[#allocation12 + $0x58] sm:$0xff]  ;;  %v171_v11 = vld [vmem:[#allocation12 + $0x50] sm:$0xff]  ;;  %157 = vst.msk [vmem:[#allocation5] sm:$0xff] %vm154_vm0, %v2213_v25 }
  0x23   :  { %v2330_v12 = vld [vmem:[#allocation15] sm:$0xff]  ;;  %v170_v13 = vld [vmem:[#allocation12 + $0x48] sm:$0xff]  ;;  %v169_v14 = vld [vmem:[#allocation12 + $0x40] sm:$0xff]  ;;  %158 = vst.msk [vmem:[#allocation6] sm:$0xff] %vm154_vm0, %v2213_v25 }
  0x24   :  { %188 = vmatpush.msra.mxu0 %v174_v3  ;;  %v168_v15 = vld [vmem:[#allocation12 + $0x38] sm:$0xff]  ;;  %v167_v16 = vld [vmem:[#allocation12 + $0x30] sm:$0xff]  ;;  %v166_v17 = vld [vmem:[#allocation12 + $0x28] sm:$0xff] }
  0x25   :  { %275 = vmatpush.bf16.msra.mxu2 %v1836_v4  ;;  %v229_v18 = vld [vmem:[%s2727_s1 + $0x10] sm:$0xff]  ;;  %v230_v19 = vld [vmem:[%s2727_s1 + $0x18] sm:$0xff]  ;;  %v164_v22 = vld [vmem:[#allocation12 + $0x18] sm:$0xff] }
  0x26   :  { %189 = vmatpush.msra.mxu0 %v173_v8  ;;  %v165_v20 = vld [vmem:[#allocation12 + $0x20] sm:$0xff]  ;;  %v236_v21 = vpack.c.bf16 %v230_v19, %v229_v18  ;;  %v163_v23 = vld [vmem:[#allocation12 + $0x10] sm:$0xff]  ;;  %v162_v24 = vld [vmem:[#allocation12 + $0x8] sm:$0xff] }
  0x27   :  { %v161_v26 = vld [vmem:[#allocation12] sm:$0xff]  ;;  %v159_v27 = vld [vmem:[#allocation9] sm:$0xff]  ;;  %v232_v30 = vld [vmem:[%s2727_s1 + $0x28] sm:$0xff] }
  0x28   :  { %190 = vmatpush.msra.mxu0 %v172_v10  ;;  %1744 = vmatmul.msk.bf16.vlgmr.msra.gmra.mxu2 %vm154_vm0, %v235_v9  ;;  %v177_v28 = vld [vmem:[#allocation12 + $0x80] sm:$0xff]  ;;  %v231_v29 = vld [vmem:[%s2727_s1 + $0x20] sm:$0xff]  ;;  %v160_v31 = vld [vmem:[#allocation9 + $0x8] sm:$0xff] }
  0x29   :  { %357 = vmatpush.bf16.msrb.mxu2 %v2326_v7  ;;  %v237_v32 = vpack.c.bf16 %v232_v30, %v231_v29  ;;  %v233_v33 = vld [vmem:[%s2727_s1 + $0x30] sm:$0xff]  ;;  %v234_v34 = vld [vmem:[%s2727_s1 + $0x38] sm:$0xff]  ;;  %v330_v36 = vld [vmem:[#allocation3] sm:$0xff]  ;;  %s2214_s1 = smov 32  }
  0x2a   :  { %191 = vmatpush.msra.mxu0 %v171_v11  ;;  %v238_v35 = vpack.c.bf16 %v234_v34, %v233_v33  ;;  %v335_v37 = vpack.c.bf16 %v330_v36, %v330_v36  ;;  %v1869_v42 = vld [vmem:[%s2732_s6] ss:$0 sm:$0xff]  ;;  %v331_v63 = vld [vmem:[#allocation4] sm:$0xff]  ;;  %v332_v25 = vld [vmem:[#allocation5] sm:$0xff] }
  0x2c   :  { %192 = vmatpush.msra.mxu0 %v170_v13 }
  0x2d   :  { %358 = vmatpush.bf16.msrb.mxu2 %v2330_v12 }
  0x2e   :  { %193 = vmatpush.msra.mxu0 %v169_v14 }
  0x30   :  { %194 = vmatpush.msra.mxu0 %v168_v15 }
  0x32   :  { %195 = vmatpush.msra.mxu0 %v167_v16 }
  0x34   :  { %196 = vmatpush.msra.mxu0 %v166_v17 }
  0x36   :  { %197 = vmatpush.msra.mxu0 %v165_v20 }
  0x38   :  { %198 = vmatpush.msra.mxu0 %v164_v22  ;;  %1745 = vmatmul.msk.bf16.gmra.mxu2 %vm154_vm0, %v236_v21  ;;  %v2387_v22 = vld [vmem:[#allocation18 + $0x8] sm:$0xff] }
  0x39   :  { %488 = vmatpush.bf16.msra.mxu3 %v2387_v22  ;;  %914 = vmatpush.bf16.msra.mxu2 %v2387_v22 }
  0x3a   :  { %199 = vmatpush.msra.mxu0 %v163_v23  ;;  %v2389_v23 = vld [vmem:[#allocation17 + $0x8] sm:$0xff] }
  0x3b   :  { %513 = vmatpush.bf16.msra.mxu1 %v2389_v23 }
  0x3c   :  { %200 = vmatpush.msra.mxu0 %v162_v24  ;;  %v2392_v24 = vld [vmem:[#allocation18] sm:$0xff] }
  0x3d   :  { %489 = vmatpush.bf16.msra.mxu3 %v2392_v24  ;;  %915 = vmatpush.bf16.msra.mxu2 %v2392_v24 }
  0x3e   :  { %201 = vmatpush.msra.mxu0 %v161_v26  ;;  %v2395_v26 = vld [vmem:[#allocation17] sm:$0xff] }
  0x3f   :  { %202 = vmatmul.f32.vlgmr.msra.gmra.mxu0 %v159_v27  ;;  %v466_v27 = vpack.c.bf16 %v332_v25, %v332_v25  ;;  %514 = vmatpush.bf16.msra.mxu1 %v2395_v26 }
  0x40   :  { %221 = vmatpush.msrb.mxu0 %v177_v28 }
  0x41   :  { %640 = vmatpush.bf16.msrb.mxu3 %v2387_v22 }
  0x42   :  { %421 = vmatpush.bf16.msra.mxu0 %v2326_v7  ;;  %1768 = vmatmul.msk.bf16.vlgmr.msra.gmra.mxu3 %vm154_vm0, %v466_v27 }
  0x43   :  { %653 = vmatpush.bf16.msrb.mxu1 %v2389_v23 }
  0x45   :  { %641 = vmatpush.bf16.msrb.mxu3 %v2392_v24 }
  0x46   :  { %422 = vmatpush.bf16.msra.mxu0 %v2330_v12 }
  0x47   :  { %1735 = vmatmul.msk.f32.vlgmr.msrb.gmra.mxu0 %vm182_vm1, %v160_v31  ;;  %654 = vmatpush.bf16.msrb.mxu1 %v2395_v26  ;;  %v333_v31 = vld [vmem:[#allocation6] sm:$0xff] }
  0x48   :  { %1746 = vmatmul.msk.bf16.gmra.mxu2 %vm154_vm0, %v237_v32 }
  0x49   :  { %777 = vmatpush.bf16.msra.mxu3 %v2387_v22 }
  0x4a   :  { %582 = vmatpush.bf16.msrb.mxu0 %v2326_v7 }
  0x4d   :  { %778 = vmatpush.bf16.msra.mxu3 %v2392_v24 }
  0x4e   :  { %583 = vmatpush.bf16.msrb.mxu0 %v2330_v12 }
  0x58   :  { %1747 = vmatmul.msk.bf16.gmra.mxu2 %vm154_vm0, %v238_v35  ;;  %v2421_v35 = vld [vmem:[%s2735_s9] ss:$0 sm:$0xff] }
  0x68   :  { %1756 = vmatmul.msk.bf16.vlgmr.msrb.gmra.mxu2 %vm154_vm0, %v335_v37 }
  0x69   :  { %1064 = vmatpush.bf16.msrb.mxu2 %v2389_v23 }
  0x6d   :  { %1065 = vmatpush.bf16.msrb.mxu2 %v2395_v26 }
  0xab   :  { %v277_v38 = vpop.f32.mrf.mxu2 }
  0xb3   :  { %v279_v39 = vpop.f32.mrf.mxu2 }
  0xbb   :  { %v282_v40 = vpop.f32.mrf.mxu2 }
  0xbc   :  { %v203_v41 = vpop.f32.mrf.mxu0 }
  0xbd   :  { %v204_v43 = vadd.f32 %v1869_v42, %v203_v41 }
  0xc3   :  { %v284_v44 = vpop.f32.mrf.mxu2 }
  0xc4   :  { %v223_v45 = vpop.f32.mrf.mxu0 }
  0xc5   :  { %v224_v46 = vadd.f32 %v223_v45, %v204_v43  ;;  %v491_v33 = vpop.f32.mrf.mxu3 }
  0xc7   :  { %v2366_v47 = vadd.f32 %v284_v44, %v224_v46  ;;  %v2368_v48 = vadd.f32 %v279_v39, %v224_v46  ;;  %v2370_v49 = vadd.f32 %v282_v40, %v224_v46  ;;  %v298_v58 = vadd.f32 %v277_v38, %v224_v46 }
  0xcb   :  { %v287_v50 = vpop.f32.mrf.mxu2 }
  0xcc   :  { %v2372_v51 = vadd.f32 %v287_v50, %v224_v46 }
  0xcd   :  { %v493_v34 = vpop.f32.mrf.mxu3 }
  0xd3   :  { %v289_v52 = vpop.f32.mrf.mxu2 }
  0xd4   :  { %v2374_v53 = vadd.f32 %v289_v52, %v224_v46 }
  0xdb   :  { %v292_v54 = vpop.f32.mrf.mxu2 }
  0xdc   :  { %v2376_v55 = vadd.f32 %v292_v54, %v224_v46 }
  0xe3   :  { %v294_v56 = vpop.f32.mrf.mxu2 }
  0xe4   :  { %v2378_v57 = vadd.f32 %v294_v56, %v224_v46 }
  0xeb   :  { %v360_v59 = vpop.f32.mrf.mxu2 }
  0xec   :  { %v364_v60 = vadd.f32 %v360_v59, %v298_v58 }
  0xee   :  { %1871 = vtanh.f32 %v364_v60  ;;  %v1757_v0 = vmul.f32 -1.442695, %v364_v60 }
  0xf0   :  { %1873 = vpow2.f32 %v1757_v0 }
  0xf3   :  { %v362_v61 = vpop.f32.mrf.mxu2 }
  0xf4   :  { %v1872_v62 = vpop.eup %1871 }
  0xf5   :  { %391 = vrot.lane.b32.xlu0 %v1872_v62, %s2206_s17 }
  0xf6   :  { %v1874_v1 = vpop.eup %1873 }
  0xf7   :  { %v368_v2 = vadd.f32 1.0, %v1874_v1 }
  0xf9   :  { %1875 = vrcp.f32 %v368_v2  ;;  %v380_v9 = vand.u32 2147483648, %v368_v2  ;;  %vm374_vm3 = vweird.f32 %v368_v2  ;;  %v378_v10 = vand.u32 2147483647, %v368_v2 }
  0xfb   :  { %v381_v13 = vor.u32 1.1754944e-38, %v380_v9  ;;  %vm379_vm5 = vcmp.eq.f32.partialorder %v378_v10, 8.507059e+37 }
  0xfd   :  { %386 = vrot.lane.b32.xlu0 %v331_v63, %s2214_s1 }
  0xff   :  { %v1876_v3 = vpop.eup %1875 }
 0x100   :  { %v370_v4 = vmul.f32 %v1876_v3, %v368_v2  ;;  %vm375_vm2 = vweird.f32 %v1876_v3 }
 0x101   :  { %vm376_vm4 = vmor %vm374_vm3, %vm375_vm2 }
 0x102   :  { %v371_v5 = vsub.f32 1.0, %v370_v4 }
 0x104   :  { %v372_v6 = vmul.f32 %v1876_v3, %v371_v5 }
 0x106   :  { %v373_v8 = vadd.f32 %v1876_v3, %v372_v6 }
 0x108   :  { %v377_v11 = vsel %vm376_vm4, %v1876_v3, %v373_v8 }
 0x109   :  { %v382_v15 = vsel %vm379_vm5, %v381_v13, %v377_v11 }
 0x167   :  { %v392_v14 = vpop.permute.xlu0 %391 }
 0x168   :  { %v394_v16 = vmul.f32 %v392_v14, %v382_v15 }
 0x16a   :  { %396 = vrot.lane.b32.xlu1 %v394_v16, %s2214_s1 }
 0x16f   :  { %v387_v17 = vpop.permute.xlu0 %386 }
 0x170   :  { %v389_v18 = vmul.f32 %v387_v17, %v382_v15 }
 0x1dc   :  { %v397_v19 = vpop.permute.xlu1 %396 }
 0x1dd   :  { %v2383_v20 = vadd.f32 %v397_v19, %v389_v18 }
 0x1df   :  { %1877 = vtanh.f32 %v2383_v20 }
 0x1e5   :  { %v1878_v21 = vpop.eup %1877 }
 0x1e6   :  { %402 = vrot.lane.b32.xlu1 %v1878_v21, %s2206_s17 }
 0x1ee   :  { %542 = vrot.lane.b32.xlu1 %v333_v31, %s2214_s1 }
 0x258   :  { %v403_v28 = vpop.permute.xlu1 %402 }
 0x259   :  { %v405_v29 = vmul.f32 %v403_v28, %v382_v15 }
 0x25b   :  { %v408_v30 = vpack.c.bf16 %v405_v29, %v405_v29 }
 0x25d   :  { %410 = vrot.lane.b32.xlu2 %v408_v30, %s2214_s1 }
 0x260   :  { %v543_v19 = vpop.permute.xlu1 %542 }
 0x2b7   :  { %v411_v32 = vpop.permute.xlu2 %410 }
 0x2b8   :  { %1758 = vmatmul.msk.bf16.vlgmr.msra.gmra.mxu0 %vm154_vm0, %v411_v32  ;;  %1777 = vmatmul.msk.bf16.vlgmr.msra.gmra.mxu1 %vm154_vm0, %v411_v32 }
 0x2b9   :  { %719 = vmatpush.bf16.msra.mxu0 %v2326_v7  ;;  %790 = vmatpush.bf16.msra.mxu1 %v2389_v23 }
 0x2bd   :  { %720 = vmatpush.bf16.msra.mxu0 %v2330_v12  ;;  %791 = vmatpush.bf16.msra.mxu1 %v2395_v26 }
 0x335   :  { %v424_v36 = vpop.f32.mrf.mxu0  ;;  %v516_v37 = vpop.f32.mrf.mxu1 }
 0x336   :  { %v428_v38 = vadd.f32 %v424_v36, %v2368_v48  ;;  %v517_v39 = vadd.f32 %v516_v37, %v491_v33 }
 0x338   :  { %1879 = vtanh.f32 %v428_v38  ;;  %v520_v40 = vadd.f32 %v2421_v35, %v517_v39  ;;  %v1759_v52 = vmul.f32 -1.442695, %v428_v38 }
 0x33a   :  { %1881 = vtanh.f32 %v520_v40  ;;  %v1778_v45 = vmul.f32 -1.442695, %v520_v40 }
 0x33c   :  { %1883 = vpow2.f32 %v1778_v45 }
 0x33d   :  { %v426_v41 = vpop.f32.mrf.mxu0  ;;  %v518_v42 = vpop.f32.mrf.mxu1 }
 0x33e   :  { %v1880_v43 = vpop.eup %1879 }
 0x33f   :  { %451 = vrot.lane.b32.xlu0 %v1880_v43, %s2206_s17 }
 0x340   :  { %v1882_v44 = vpop.eup %1881 }
 0x341   :  { %547 = vrot.lane.b32.xlu2 %v1882_v44, %s2206_s17 }
 0x342   :  { %v1884_v46 = vpop.eup %1883 }
 0x343   :  { %v524_v50 = vadd.f32 1.0, %v1884_v46 }
 0x345   :  { %1885 = vrcp.f32 %v524_v50  ;;  %v536_v62 = vand.u32 2147483648, %v524_v50  ;;  %vm530_vm7 = vweird.f32 %v524_v50  ;;  %v534_v63 = vand.u32 2147483647, %v524_v50 }
 0x346   :  { %1887 = vpow2.f32 %v1759_v52 }
 0x347   :  { %v537_v1 = vor.u32 1.1754944e-38, %v536_v62  ;;  %vm535_vm9 = vcmp.eq.f32.partialorder %v534_v63, 8.507059e+37 }
 0x34b   :  { %v1886_v48 = vpop.eup %1885 }
 0x34c   :  { %v526_v54 = vmul.f32 %v1886_v48, %v524_v50  ;;  %v1888_v58 = vpop.eup %1887  ;;  %vm531_vm6 = vweird.f32 %v1886_v48 }
 0x34d   :  { %v432_v59 = vadd.f32 1.0, %v1888_v58  ;;  %vm532_vm8 = vmor %vm530_vm7, %vm531_vm6 }
 0x34e   :  { %v527_v56 = vsub.f32 1.0, %v526_v54 }
 0x34f   :  { %1889 = vrcp.f32 %v432_v59  ;;  %v444_v11 = vand.u32 2147483648, %v432_v59  ;;  %vm438_vm11 = vweird.f32 %v432_v59  ;;  %v442_v13 = vand.u32 2147483647, %v432_v59 }
 0x350   :  { %v528_v60 = vmul.f32 %v1886_v48, %v527_v56 }
 0x351   :  { %v445_v15 = vor.u32 1.1754944e-38, %v444_v11  ;;  %vm443_vm13 = vcmp.eq.f32.partialorder %v442_v13, 8.507059e+37 }
 0x352   :  { %v529_v61 = vadd.f32 %v1886_v48, %v528_v60 }
 0x354   :  { %v533_v0 = vsel %vm532_vm8, %v1886_v48, %v529_v61 }
 0x355   :  { %v1890_v2 = vpop.eup %1889  ;;  %v538_v3 = vsel %vm535_vm9, %v537_v1, %v533_v0 }
 0x356   :  { %v434_v6 = vmul.f32 %v1890_v2, %v432_v59  ;;  %vm439_vm10 = vweird.f32 %v1890_v2  ;;  %v545_v21 = vmul.f32 %v543_v19, %v538_v3 }
 0x357   :  { %vm440_vm12 = vmor %vm438_vm11, %vm439_vm10 }
 0x358   :  { %v435_v8 = vsub.f32 1.0, %v434_v6 }
 0x35a   :  { %v436_v9 = vmul.f32 %v1890_v2, %v435_v8 }
 0x35c   :  { %v437_v10 = vadd.f32 %v1890_v2, %v436_v9 }
 0x35e   :  { %v441_v14 = vsel %vm440_vm12, %v1890_v2, %v437_v10 }
 0x35f   :  { %v446_v17 = vsel %vm443_vm13, %v445_v15, %v441_v14 }
 0x360   :  { %v449_v29 = vmul.f32 %v446_v17, %v2383_v20 }
 0x39b   :  { %v548_v4 = vpop.permute.xlu2 %547 }
 0x39c   :  { %v550_v5 = vmul.f32 %v548_v4, %v538_v3 }
 0x39e   :  { %552 = vrot.lane.b32.xlu2 %v550_v5, %s2214_s1 }
 0x3b1   :  { %v452_v16 = vpop.permute.xlu0 %451 }
 0x3b2   :  { %v454_v18 = vmul.f32 %v452_v16, %v446_v17 }
 0x3b4   :  { %456 = vrot.lane.b32.xlu0 %v454_v18, %s2214_s1 }
 0x3f8   :  { %v553_v25 = vpop.permute.xlu2 %552 }
 0x3f9   :  { %v2429_v27 = vadd.f32 %v553_v25, %v545_v21 }
 0x3fb   :  { %1891 = vtanh.f32 %v2429_v27 }
 0x401   :  { %v1892_v28 = vpop.eup %1891 }
 0x402   :  { %558 = vrot.lane.b32.xlu1 %v1892_v28, %s2206_s17 }
 0x426   :  { %v457_v30 = vpop.permute.xlu0 %456 }
 0x427   :  { %v2434_v31 = vadd.f32 %v457_v30, %v449_v29 }
 0x429   :  { %1893 = vtanh.f32 %v2434_v31 }
 0x42f   :  { %v1894_v32 = vpop.eup %1893 }
 0x430   :  { %462 = vrot.lane.b32.xlu2 %v1894_v32, %s2206_s17 }
 0x474   :  { %v559_v33 = vpop.permute.xlu1 %558 }
 0x475   :  { %v2438_v34 = vmul.f32 %v559_v33, %v538_v3 }
 0x477   :  { %v627_v36 = vpack.c.bf16 %v2438_v34, %v2438_v34 }
 0x479   :  { %629 = vrot.lane.b32.xlu0 %v627_v36, %s2214_s1 }
 0x48a   :  { %v463_v37 = vpop.permute.xlu2 %462 }
 0x48b   :  { %v465_v38 = vmul.f32 %v463_v37, %v446_v17 }
 0x48d   :  { %v569_v39 = vpack.c.bf16 %v465_v38, %v465_v38 }
 0x48f   :  { %571 = vrot.lane.b32.xlu1 %v569_v39, %s2214_s1 }
 0x4eb   :  { %v630_v20 = vpop.permute.xlu0 %629 }
 0x4ec   :  { %1781 = vmatmul.msk.bf16.vlgmr.msrb.gmra.mxu3 %vm154_vm0, %v630_v20 }
 0x4ed   :  { %927 = vmatpush.bf16.msrb.mxu3 %v2389_v23 }
 0x4f1   :  { %928 = vmatpush.bf16.msrb.mxu3 %v2395_v26 }
 0x501   :  { %v572_v40 = vpop.permute.xlu1 %571 }
 0x502   :  { %1779 = vmatmul.msk.bf16.vlgmr.msrb.gmra.mxu0 %vm154_vm0, %v572_v40  ;;  %1782 = vmatmul.msk.bf16.vlgmr.msrb.gmra.mxu1 %vm154_vm0, %v572_v40 }
 0x503   :  { %856 = vmatpush.bf16.msrb.mxu0 %v2326_v7  ;;  %993 = vmatpush.bf16.msrb.mxu1 %v2326_v7 }
 0x507   :  { %857 = vmatpush.bf16.msrb.mxu0 %v2330_v12  ;;  %994 = vmatpush.bf16.msrb.mxu1 %v2330_v12 }
 0x56f   :  { %v643_v41 = vpop.f32.mrf.mxu3 }
 0x577   :  { %v645_v42 = vpop.f32.mrf.mxu3 }
 0x57f   :  { %v585_v43 = vpop.f32.mrf.mxu0  ;;  %v656_v44 = vpop.f32.mrf.mxu1 }
 0x580   :  { %v589_v45 = vadd.f32 %v585_v43, %v2370_v49  ;;  %v657_v46 = vadd.f32 %v656_v44, %v643_v41 }
 0x582   :  { %1895 = vtanh.f32 %v589_v45  ;;  %v660_v50 = vadd.f32 %v2421_v35, %v657_v46  ;;  %v1780_v61 = vmul.f32 -1.442695, %v589_v45 }
 0x584   :  { %1897 = vtanh.f32 %v660_v50  ;;  %v1783_v58 = vmul.f32 -1.442695, %v660_v50 }
 0x586   :  { %1899 = vpow2.f32 %v1783_v58 }
 0x587   :  { %v587_v52 = vpop.f32.mrf.mxu0  ;;  %v658_v48 = vpop.f32.mrf.mxu1 }
 0x588   :  { %v1896_v54 = vpop.eup %1895 }
 0x589   :  { %612 = vrot.lane.b32.xlu0 %v1896_v54, %s2206_s17 }
 0x58a   :  { %v1898_v56 = vpop.eup %1897 }
 0x58b   :  { %683 = vrot.lane.b32.xlu2 %v1898_v56, %s2206_s17 }
 0x58c   :  { %v1900_v59 = vpop.eup %1899 }
 0x58d   :  { %v664_v60 = vadd.f32 1.0, %v1900_v59 }
 0x58f   :  { %1901 = vrcp.f32 %v664_v60  ;;  %v676_v4 = vand.u32 2147483648, %v664_v60  ;;  %vm670_vm15 = vweird.f32 %v664_v60  ;;  %v674_v5 = vand.u32 2147483647, %v664_v60 }
 0x590   :  { %1903 = vpow2.f32 %v1780_v61 }
 0x591   :  { %v677_v8 = vor.u32 1.1754944e-38, %v676_v4  ;;  %vm675_vm2 = vcmp.eq.f32.partialorder %v674_v5, 8.507059e+37 }
 0x595   :  { %v1902_v49 = vpop.eup %1901 }
 0x596   :  { %v666_v62 = vmul.f32 %v1902_v49, %v664_v60  ;;  %v1904_v0 = vpop.eup %1903  ;;  %vm671_vm14 = vweird.f32 %v1902_v49 }
 0x597   :  { %v593_v1 = vadd.f32 1.0, %v1904_v0  ;;  %vm672_vm1 = vmor %vm670_vm15, %vm671_vm14 }
 0x598   :  { %v667_v63 = vsub.f32 1.0, %v666_v62 }
 0x599   :  { %1905 = vrcp.f32 %v593_v1  ;;  %v605_v18 = vand.u32 2147483648, %v593_v1  ;;  %vm599_vm4 = vweird.f32 %v593_v1  ;;  %v603_v19 = vand.u32 2147483647, %v593_v1 }
 0x59a   :  { %v668_v2 = vmul.f32 %v1902_v49, %v667_v63 }
 0x59b   :  { %v606_v25 = vor.u32 1.1754944e-38, %v605_v18  ;;  %vm604_vm6 = vcmp.eq.f32.partialorder %v603_v19, 8.507059e+37 }
 0x59c   :  { %v669_v3 = vadd.f32 %v1902_v49, %v668_v2 }
 0x59e   :  { %v673_v6 = vsel %vm672_vm1, %v1902_v49, %v669_v3 }
 0x59f   :  { %v1906_v9 = vpop.eup %1905  ;;  %v678_v11 = vsel %vm675_vm2, %v677_v8, %v673_v6 }
 0x5a0   :  { %v595_v14 = vmul.f32 %v1906_v9, %v593_v1  ;;  %vm600_vm3 = vweird.f32 %v1906_v9  ;;  %v681_v37 = vmul.f32 %v678_v11, %v2429_v27 }
 0x5a1   :  { %vm601_vm5 = vmor %vm599_vm4, %vm600_vm3 }
 0x5a2   :  { %v596_v15 = vsub.f32 1.0, %v595_v14 }
 0x5a4   :  { %v597_v16 = vmul.f32 %v1906_v9, %v596_v15 }
 0x5a6   :  { %v598_v17 = vadd.f32 %v1906_v9, %v597_v16 }
 0x5a8   :  { %v602_v21 = vsel %vm601_vm5, %v1906_v9, %v598_v17 }
 0x5a9   :  { %v607_v29 = vsel %vm604_vm6, %v606_v25, %v602_v21 }
 0x5aa   :  { %v610_v32 = vmul.f32 %v607_v29, %v2434_v31 }
 0x5e5   :  { %v684_v10 = vpop.permute.xlu2 %683 }
 0x5e6   :  { %v686_v13 = vmul.f32 %v684_v10, %v678_v11 }
 0x5e8   :  { %688 = vrot.lane.b32.xlu1 %v686_v13, %s2214_s1 }
 0x5fb   :  { %v613_v28 = vpop.permute.xlu0 %612 }
 0x5fc   :  { %v615_v30 = vmul.f32 %v613_v28, %v607_v29 }
 0x5fe   :  { %617 = vrot.lane.b32.xlu2 %v615_v30, %s2214_s1 }
 0x658   :  { %v618_v33 = vpop.permute.xlu2 %617 }
 0x659   :  { %v2460_v36 = vadd.f32 %v618_v33, %v610_v32 }
 0x65a   :  { %v689_v38 = vpop.permute.xlu1 %688 }
 0x65b   :  { %1907 = vtanh.f32 %v2460_v36  ;;  %v2464_v39 = vadd.f32 %v689_v38, %v681_v37 }
 0x65d   :  { %1909 = vtanh.f32 %v2464_v39 }
 0x661   :  { %v1908_v20 = vpop.eup %1907 }
 0x662   :  { %623 = vrot.lane.b32.xlu1 %v1908_v20, %s2206_s17 }
 0x663   :  { %v1910_v40 = vpop.eup %1909 }
 0x664   :  { %694 = vrot.lane.b32.xlu0 %v1910_v40, %s2206_s17 }
 0x6d4   :  { %v624_v41 = vpop.permute.xlu1 %623 }
 0x6d5   :  { %v626_v31 = vmul.f32 %v624_v41, %v607_v29 }
 0x6d6   :  { %v695_v43 = vpop.permute.xlu0 %694 }
 0x6d7   :  { %v706_v42 = vpack.c.bf16 %v626_v31, %v626_v31  ;;  %v2469_v44 = vmul.f32 %v695_v43, %v678_v11 }
 0x6d9   :  { %708 = vrot.lane.b32.xlu0 %v706_v42, %s2214_s1  ;;  %v764_v27 = vpack.c.bf16 %v2469_v44, %v2469_v44 }
 0x6db   :  { %766 = vrot.lane.b32.xlu2 %v764_v27, %s2214_s1 }
 0x735   :  { %v767_v45 = vpop.permute.xlu2 %766 }
 0x736   :  { %1786 = vmatmul.msk.bf16.vlgmr.msra.gmra.mxu3 %vm154_vm0, %v767_v45 }
 0x737   :  { %1130 = vmatpush.bf16.msra.mxu3 %v2326_v7 }
 0x73b   :  { %1131 = vmatpush.bf16.msra.mxu3 %v2330_v12 }
 0x74b   :  { %v709_v46 = vpop.permute.xlu0 %708 }
 0x74c   :  { %1784 = vmatmul.msk.bf16.vlgmr.msra.gmra.mxu0 %vm154_vm0, %v709_v46  ;;  %1787 = vmatmul.msk.bf16.vlgmr.msra.gmra.mxu1 %vm154_vm0, %v709_v46 }
 0x74d   :  { %1051 = vmatpush.bf16.msra.mxu0 %v2387_v22  ;;  %1188 = vmatpush.bf16.msra.mxu1 %v2387_v22 }
 0x751   :  { %1052 = vmatpush.bf16.msra.mxu0 %v2392_v24  ;;  %1189 = vmatpush.bf16.msra.mxu1 %v2392_v24 }
 0x7b9   :  { %v780_v50 = vpop.f32.mrf.mxu3 }
 0x7c1   :  { %v782_v52 = vpop.f32.mrf.mxu3 }
 0x7c9   :  { %v722_v48 = vpop.f32.mrf.mxu0  ;;  %v793_v54 = vpop.f32.mrf.mxu1 }
 0x7ca   :  { %v726_v56 = vadd.f32 %v722_v48, %v2366_v47  ;;  %v794_v58 = vadd.f32 %v793_v54, %v780_v50 }
 0x7cc   :  { %1911 = vtanh.f32 %v726_v56  ;;  %v797_v59 = vadd.f32 %v2421_v35, %v794_v58  ;;  %v1785_v2 = vmul.f32 -1.442695, %v726_v56 }
 0x7ce   :  { %1913 = vtanh.f32 %v797_v59  ;;  %v1788_v63 = vmul.f32 -1.442695, %v797_v59 }
 0x7d0   :  { %1915 = vpow2.f32 %v1788_v63 }
 0x7d1   :  { %v724_v60 = vpop.f32.mrf.mxu0  ;;  %v795_v61 = vpop.f32.mrf.mxu1 }
 0x7d2   :  { %v1912_v49 = vpop.eup %1911 }
 0x7d3   :  { %749 = vrot.lane.b32.xlu1 %v1912_v49, %s2206_s17 }
 0x7d4   :  { %v1914_v62 = vpop.eup %1913 }
 0x7d5   :  { %820 = vrot.lane.b32.xlu2 %v1914_v62, %s2206_s17 }
 0x7d6   :  { %v1916_v0 = vpop.eup %1915 }
 0x7d7   :  { %v801_v1 = vadd.f32 1.0, %v1916_v0 }
 0x7d9   :  { %1917 = vrcp.f32 %v801_v1  ;;  %v813_v10 = vand.u32 2147483648, %v801_v1  ;;  %vm807_vm8 = vweird.f32 %v801_v1  ;;  %v811_v11 = vand.u32 2147483647, %v801_v1 }
 0x7da   :  { %1919 = vpow2.f32 %v1785_v2 }
 0x7db   :  { %v814_v14 = vor.u32 1.1754944e-38, %v813_v10  ;;  %vm812_vm10 = vcmp.eq.f32.partialorder %v811_v11, 8.507059e+37 }
 0x7df   :  { %v1918_v47 = vpop.eup %1917 }
 0x7e0   :  { %v803_v3 = vmul.f32 %v1918_v47, %v801_v1  ;;  %v1920_v5 = vpop.eup %1919  ;;  %vm808_vm7 = vweird.f32 %v1918_v47 }
 0x7e1   :  { %v730_v6 = vadd.f32 1.0, %v1920_v5  ;;  %vm809_vm9 = vmor %vm807_vm8, %vm808_vm7 }
 0x7e2   :  { %v804_v4 = vsub.f32 1.0, %v803_v3 }
 0x7e3   :  { %1921 = vrcp.f32 %v730_v6  ;;  %v742_v29 = vand.u32 2147483648, %v730_v6  ;;  %vm736_vm12 = vweird.f32 %v730_v6  ;;  %v740_v30 = vand.u32 2147483647, %v730_v6 }
 0x7e4   :  { %v805_v8 = vmul.f32 %v1918_v47, %v804_v4 }
 0x7e5   :  { %v743_v33 = vor.u32 1.1754944e-38, %v742_v29  ;;  %vm741_vm14 = vcmp.eq.f32.partialorder %v740_v30, 8.507059e+37 }
 0x7e6   :  { %v806_v9 = vadd.f32 %v1918_v47, %v805_v8 }
 0x7e8   :  { %v810_v13 = vsel %vm809_vm9, %v1918_v47, %v806_v9 }
 0x7e9   :  { %v1922_v15 = vpop.eup %1921  ;;  %v815_v17 = vsel %vm812_vm10, %v814_v14, %v810_v13 }
 0x7ea   :  { %v732_v19 = vmul.f32 %v1922_v15, %v730_v6  ;;  %vm737_vm11 = vweird.f32 %v1922_v15  ;;  %v818_v40 = vmul.f32 %v815_v17, %v2464_v39 }
 0x7eb   :  { %vm738_vm13 = vmor %vm736_vm12, %vm737_vm11 }
 0x7ec   :  { %v733_v21 = vsub.f32 1.0, %v732_v19 }
 0x7ee   :  { %v734_v25 = vmul.f32 %v1922_v15, %v733_v21 }
 0x7f0   :  { %v735_v28 = vadd.f32 %v1922_v15, %v734_v25 }
 0x7f2   :  { %v739_v32 = vsel %vm738_vm13, %v1922_v15, %v735_v28 }
 0x7f3   :  { %v744_v38 = vsel %vm741_vm14, %v743_v33, %v739_v32 }
 0x7f4   :  { %v747_v43 = vmul.f32 %v744_v38, %v2460_v36 }
 0x82f   :  { %v821_v16 = vpop.permute.xlu2 %820 }
 0x830   :  { %v823_v18 = vmul.f32 %v821_v16, %v815_v17 }
 0x832   :  { %825 = vrot.lane.b32.xlu1 %v823_v18, %s2214_s1 }
 0x845   :  { %v750_v37 = vpop.permute.xlu1 %749 }
 0x846   :  { %v752_v20 = vmul.f32 %v750_v37, %v744_v38 }
 0x848   :  { %754 = vrot.lane.b32.xlu0 %v752_v20, %s2214_s1 }
 0x8a4   :  { %v826_v41 = vpop.permute.xlu1 %825 }
 0x8a5   :  { %v2491_v31 = vadd.f32 %v826_v41, %v818_v40 }
 0x8a7   :  { %1923 = vtanh.f32 %v2491_v31 }
 0x8ad   :  { %v1924_v42 = vpop.eup %1923 }
 0x8ae   :  { %831 = vrot.lane.b32.xlu0 %v1924_v42, %s2206_s17 }
 0x8ba   :  { %v755_v27 = vpop.permute.xlu0 %754 }
 0x8bb   :  { %v2496_v45 = vadd.f32 %v755_v27, %v747_v43 }
 0x8bd   :  { %1925 = vtanh.f32 %v2496_v45 }
 0x8c3   :  { %v1926_v46 = vpop.eup %1925 }
 0x8c4   :  { %760 = vrot.lane.b32.xlu2 %v1926_v46, %s2206_s17 }
 0x91e   :  { %v761_v50 = vpop.permute.xlu2 %760 }
 0x91f   :  { %v763_v39 = vmul.f32 %v761_v50, %v744_v38 }
 0x920   :  { %v832_v48 = vpop.permute.xlu0 %831 }
 0x921   :  { %v843_v52 = vpack.c.bf16 %v763_v39, %v763_v39  ;;  %v2500_v54 = vmul.f32 %v832_v48, %v815_v17 }
 0x923   :  { %845 = vrot.lane.b32.xlu1 %v843_v52, %s2214_s1  ;;  %v901_v56 = vpack.c.bf16 %v2500_v54, %v2500_v54 }
 0x925   :  { %903 = vrot.lane.b32.xlu2 %v901_v56, %s2214_s1 }
 0x97f   :  { %v904_v36 = vpop.permute.xlu2 %903 }
 0x980   :  { %1791 = vmatmul.msk.bf16.vlgmr.msra.gmra.mxu2 %vm154_vm0, %v904_v36 }
 0x981   :  { %1267 = vmatpush.bf16.msra.mxu2 %v2326_v7 }
 0x985   :  { %1268 = vmatpush.bf16.msra.mxu2 %v2330_v12 }
 0x995   :  { %v846_v58 = vpop.permute.xlu1 %845 }
 0x996   :  { %1789 = vmatmul.msk.bf16.vlgmr.msrb.gmra.mxu0 %vm154_vm0, %v846_v58  ;;  %1792 = vmatmul.msk.bf16.vlgmr.msrb.gmra.mxu3 %vm154_vm0, %v846_v58 }
 0x997   :  { %1201 = vmatpush.bf16.msrb.mxu0 %v2389_v23  ;;  %1325 = vmatpush.bf16.msrb.mxu3 %v2387_v22 }
 0x99b   :  { %1202 = vmatpush.bf16.msrb.mxu0 %v2395_v26  ;;  %1326 = vmatpush.bf16.msrb.mxu3 %v2392_v24 }
 0xa03   :  { %v917_v59 = vpop.f32.mrf.mxu2 }
 0xa0b   :  { %v919_v60 = vpop.f32.mrf.mxu2 }
 0xa13   :  { %v859_v61 = vpop.f32.mrf.mxu0 }
 0xa14   :  { %v863_v7 = vadd.f32 %v859_v61, %v2372_v51 }
 0xa16   :  { %1927 = vtanh.f32 %v863_v7  ;;  %v1790_v47 = vmul.f32 -1.442695, %v863_v7 }
 0xa19   :  { %v930_v12 = vpop.f32.mrf.mxu3 }
 0xa1a   :  { %v931_v49 = vadd.f32 %v930_v12, %v917_v59 }
 0xa1b   :  { %v861_v62 = vpop.f32.mrf.mxu0 }
 0xa1c   :  { %v1928_v63 = vpop.eup %1927  ;;  %v934_v0 = vadd.f32 %v2421_v35, %v931_v49 }
 0xa1d   :  { %886 = vrot.lane.b32.xlu0 %v1928_v63, %s2206_s17 }
 0xa1e   :  { %1929 = vtanh.f32 %v934_v0  ;;  %v1793_v3 = vmul.f32 -1.442695, %v934_v0 }
 0xa1f   :  { %1931 = vpow2.f32 %v1790_v47 }
 0xa20   :  { %1933 = vpow2.f32 %v1793_v3 }
 0xa21   :  { %v932_v1 = vpop.f32.mrf.mxu3 }
 0xa24   :  { %v1930_v2 = vpop.eup %1929 }
 0xa25   :  { %957 = vrot.lane.b32.xlu1 %v1930_v2, %s2206_s17  ;;  %v1932_v4 = vpop.eup %1931 }
 0xa26   :  { %v867_v51 = vadd.f32 1.0, %v1932_v4  ;;  %v1934_v5 = vpop.eup %1933 }
 0xa27   :  { %v938_v6 = vadd.f32 1.0, %v1934_v5 }
 0xa28   :  { %1935 = vrcp.f32 %v867_v51  ;;  %v879_v17 = vand.u32 2147483648, %v867_v51  ;;  %vm873_vm1 = vweird.f32 %v867_v51  ;;  %v877_v18 = vand.u32 2147483647, %v867_v51 }
 0xa29   :  { %1937 = vrcp.f32 %v938_v6  ;;  %v950_v33 = vand.u32 2147483648, %v938_v6  ;;  %vm944_vm5 = vweird.f32 %v938_v6  ;;  %v948_v37 = vand.u32 2147483647, %v938_v6 }
 0xa2a   :  { %v880_v25 = vor.u32 1.1754944e-38, %v879_v17  ;;  %vm878_vm3 = vcmp.eq.f32.partialorder %v877_v18, 8.507059e+37 }
 0xa2b   :  { %v951_v20 = vor.u32 1.1754944e-38, %v950_v33  ;;  %vm949_vm7 = vcmp.eq.f32.partialorder %v948_v37, 8.507059e+37 }
 0xa2e   :  { %v1936_v8 = vpop.eup %1935 }
 0xa2f   :  { %v869_v9 = vmul.f32 %v1936_v8, %v867_v51  ;;  %v1938_v11 = vpop.eup %1937  ;;  %vm874_vm15 = vweird.f32 %v1936_v8 }
 0xa30   :  { %v940_v14 = vmul.f32 %v1938_v11, %v938_v6  ;;  %vm875_vm2 = vmor %vm873_vm1, %vm874_vm15  ;;  %vm945_vm4 = vweird.f32 %v1938_v11 }
 0xa31   :  { %v870_v10 = vsub.f32 1.0, %v869_v9  ;;  %vm946_vm6 = vmor %vm944_vm5, %vm945_vm4 }
 0xa32   :  { %v941_v16 = vsub.f32 1.0, %v940_v14 }
 0xa33   :  { %v871_v13 = vmul.f32 %v1936_v8, %v870_v10 }
 0xa34   :  { %v942_v21 = vmul.f32 %v1938_v11, %v941_v16 }
 0xa35   :  { %v872_v15 = vadd.f32 %v1936_v8, %v871_v13 }
 0xa36   :  { %v943_v32 = vadd.f32 %v1938_v11, %v942_v21 }
 0xa37   :  { %v876_v19 = vsel %vm875_vm2, %v1936_v8, %v872_v15 }
 0xa38   :  { %v881_v29 = vsel %vm878_vm3, %v880_v25, %v876_v19  ;;  %v947_v38 = vsel %vm946_vm6, %v1938_v11, %v943_v32 }
 0xa39   :  { %v952_v41 = vsel %vm949_vm7, %v951_v20, %v947_v38  ;;  %v884_v43 = vmul.f32 %v881_v29, %v2496_v45 }
 0xa3a   :  { %v955_v39 = vmul.f32 %v952_v41, %v2491_v31 }
 0xa8f   :  { %v887_v28 = vpop.permute.xlu0 %886 }
 0xa90   :  { %v889_v30 = vmul.f32 %v887_v28, %v881_v29 }
 0xa92   :  { %891 = vrot.lane.b32.xlu2 %v889_v30, %s2214_s1 }
 0xa97   :  { %v958_v40 = vpop.permute.xlu1 %957 }
 0xa98   :  { %v960_v42 = vmul.f32 %v958_v40, %v952_v41 }
 0xa9a   :  { %962 = vrot.lane.b32.xlu0 %v960_v42, %s2214_s1 }
 0xaec   :  { %v892_v27 = vpop.permute.xlu2 %891 }
 0xaed   :  { %v2522_v46 = vadd.f32 %v892_v27, %v884_v43 }
 0xaef   :  { %1939 = vtanh.f32 %v2522_v46 }
 0xaf5   :  { %v1940_v50 = vpop.eup %1939 }
 0xaf6   :  { %897 = vrot.lane.b32.xlu1 %v1940_v50, %s2206_s17 }
 0xb0c   :  { %v963_v52 = vpop.permute.xlu0 %962 }
 0xb0d   :  { %v2527_v48 = vadd.f32 %v963_v52, %v955_v39 }
 0xb0f   :  { %1941 = vtanh.f32 %v2527_v48 }
 0xb15   :  { %v1942_v56 = vpop.eup %1941 }
 0xb16   :  { %968 = vrot.lane.b32.xlu2 %v1942_v56, %s2206_s17 }
 0xb68   :  { %v898_v36 = vpop.permute.xlu1 %897 }
 0xb69   :  { %v900_v45 = vmul.f32 %v898_v36, %v881_v29 }
 0xb6b   :  { %v980_v58 = vpack.c.bf16 %v900_v45, %v900_v45 }
 0xb6d   :  { %982 = vrot.lane.b32.xlu0 %v980_v58, %s2214_s1 }
 0xb70   :  { %v969_v59 = vpop.permute.xlu2 %968 }
 0xb71   :  { %v2532_v60 = vmul.f32 %v969_v59, %v952_v41 }
 0xb73   :  { %v1038_v61 = vpack.c.bf16 %v2532_v60, %v2532_v60 }
 0xb75   :  { %1040 = vrot.lane.b32.xlu1 %v1038_v61, %s2214_s1 }
 0xbdf   :  { %v983_v31 = vpop.permute.xlu0 %982 }
 0xbe0   :  { %1794 = vmatmul.msk.bf16.vlgmr.msrb.gmra.mxu1 %vm154_vm0, %v983_v31  ;;  %1797 = vmatmul.msk.bf16.vlgmr.msrb.gmra.mxu2 %vm154_vm0, %v983_v31 }
 0xbe1   :  { %1338 = vmatpush.bf16.msrb.mxu1 %v2389_v23  ;;  %1422 = vmatpush.bf16.msrb.mxu2 %v2389_v23 }
 0xbe5   :  { %1339 = vmatpush.bf16.msrb.mxu1 %v2395_v26  ;;  %1423 = vmatpush.bf16.msrb.mxu2 %v2395_v26 }
 0xbe7   :  { %v1041_v7 = vpop.permute.xlu1 %1040 }
 0xbe8   :  { %1796 = vmatmul.msk.bf16.vlgmr.msra.gmra.mxu0 %vm154_vm0, %v1041_v7 }
 0xbe9   :  { %1403 = vmatpush.bf16.msra.mxu0 %v2387_v22 }
 0xbed   :  { %1404 = vmatpush.bf16.msra.mxu0 %v2392_v24 }
 0xc5d   :  { %v996_v12 = vpop.f32.mrf.mxu1 }
 0xc5e   :  { %v1000_v49 = vadd.f32 %v996_v12, %v2374_v53 }
 0xc60   :  { %1943 = vtanh.f32 %v1000_v49  ;;  %v1795_v22 = vmul.f32 -1.442695, %v1000_v49 }
 0xc63   :  { %v1067_v62 = vpop.f32.mrf.mxu2 }
 0xc65   :  { %v998_v63 = vpop.f32.mrf.mxu1  ;;  %v1054_v0 = vpop.f32.mrf.mxu0 }
 0xc66   :  { %v1944_v1 = vpop.eup %1943  ;;  %v1068_v23 = vadd.f32 %v1067_v62, %v1054_v0 }
 0xc67   :  { %1023 = vrot.lane.b32.xlu2 %v1944_v1, %s2206_s17 }
 0xc68   :  { %v1071_v26 = vadd.f32 %v2421_v35, %v1068_v23 }
 0xc6a   :  { %1945 = vtanh.f32 %v1071_v26  ;;  %v1798_v6 = vmul.f32 -1.442695, %v1071_v26 }
 0xc6b   :  { %v1069_v2 = vpop.f32.mrf.mxu2  ;;  %1947 = vpow2.f32 %v1795_v22 }
 0xc6d   :  { %v1056_v47 = vpop.f32.mrf.mxu0 }
 0xc70   :  { %v1946_v3 = vpop.eup %1945 }
 0xc71   :  { %1094 = vrot.lane.b32.xlu0 %v1946_v3, %s2206_s17  ;;  %v1948_v24 = vpop.eup %1947 }
 0xc72   :  { %v1004_v53 = vadd.f32 1.0, %v1948_v24 }
 0xc74   :  { %1949 = vrcp.f32 %v1004_v53  ;;  %v1016_v10 = vand.u32 2147483648, %v1004_v53  ;;  %vm1010_vm9 = vweird.f32 %v1004_v53  ;;  %v1014_v11 = vand.u32 2147483647, %v1004_v53 }
 0xc75   :  { %1951 = vpow2.f32 %v1798_v6 }
 0xc76   :  { %v1017_v14 = vor.u32 1.1754944e-38, %v1016_v10  ;;  %vm1015_vm11 = vcmp.eq.f32.partialorder %v1014_v11, 8.507059e+37 }
 0xc7a   :  { %v1950_v4 = vpop.eup %1949 }
 0xc7b   :  { %v1006_v51 = vmul.f32 %v1950_v4, %v1004_v53  ;;  %vm1011_vm8 = vweird.f32 %v1950_v4  ;;  %v1952_v15 = vpop.eup %1951 }
 0xc7c   :  { %vm1012_vm10 = vmor %vm1010_vm9, %vm1011_vm8  ;;  %v1075_v19 = vadd.f32 1.0, %v1952_v15 }
 0xc7d   :  { %v1007_v5 = vsub.f32 1.0, %v1006_v51 }
 0xc7e   :  { %1953 = vrcp.f32 %v1075_v19  ;;  %v1087_v32 = vand.u32 2147483648, %v1075_v19  ;;  %vm1081_vm13 = vweird.f32 %v1075_v19  ;;  %v1085_v33 = vand.u32 2147483647, %v1075_v19 }
 0xc7f   :  { %v1008_v8 = vmul.f32 %v1950_v4, %v1007_v5 }
 0xc80   :  { %v1088_v38 = vor.u32 1.1754944e-38, %v1087_v32  ;;  %vm1086_vm15 = vcmp.eq.f32.partialorder %v1085_v33, 8.507059e+37 }
 0xc81   :  { %v1009_v9 = vadd.f32 %v1950_v4, %v1008_v8 }
 0xc83   :  { %v1013_v13 = vsel %vm1012_vm10, %v1950_v4, %v1009_v9 }
 0xc84   :  { %v1018_v16 = vsel %vm1015_vm11, %v1017_v14, %v1013_v13  ;;  %v1954_v21 = vpop.eup %1953 }
 0xc85   :  { %v1077_v25 = vmul.f32 %v1954_v21, %v1075_v19  ;;  %vm1082_vm12 = vweird.f32 %v1954_v21  ;;  %v1021_v42 = vmul.f32 %v1018_v16, %v2522_v46 }
 0xc86   :  { %vm1083_vm14 = vmor %vm1081_vm13, %vm1082_vm12 }
 0xc87   :  { %v1078_v28 = vsub.f32 1.0, %v1077_v25 }
 0xc89   :  { %v1079_v29 = vmul.f32 %v1954_v21, %v1078_v28 }
 0xc8b   :  { %v1080_v30 = vadd.f32 %v1954_v21, %v1079_v29 }
 0xc8d   :  { %v1084_v37 = vsel %vm1083_vm14, %v1954_v21, %v1080_v30 }
 0xc8e   :  { %v1089_v40 = vsel %vm1086_vm15, %v1088_v38, %v1084_v37 }
 0xc8f   :  { %v1092_v39 = vmul.f32 %v1089_v40, %v2527_v48 }
 0xcc1   :  { %v1024_v17 = vpop.permute.xlu2 %1023 }
 0xcc2   :  { %v1026_v18 = vmul.f32 %v1024_v17, %v1018_v16 }
 0xcc4   :  { %1028 = vrot.lane.b32.xlu1 %v1026_v18, %s2214_s1 }
 0xce3   :  { %v1095_v20 = vpop.permute.xlu0 %1094 }
 0xce4   :  { %v1097_v41 = vmul.f32 %v1095_v20, %v1089_v40 }
 0xce6   :  { %1099 = vrot.lane.b32.xlu2 %v1097_v41, %s2214_s1 }
 0xd36   :  { %v1029_v43 = vpop.permute.xlu1 %1028 }
 0xd37   :  { %v2553_v27 = vadd.f32 %v1029_v43, %v1021_v42 }
 0xd39   :  { %1955 = vtanh.f32 %v2553_v27 }
 0xd3f   :  { %v1956_v50 = vpop.eup %1955 }
 0xd40   :  { %1034 = vrot.lane.b32.xlu0 %v1956_v50, %s2206_s17  ;;  %v1100_v52 = vpop.permute.xlu2 %1099 }
 0xd41   :  { %v2558_v56 = vadd.f32 %v1100_v52, %v1092_v39 }
 0xd43   :  { %1957 = vtanh.f32 %v2558_v56 }
 0xd49   :  { %v1958_v36 = vpop.eup %1957 }
 0xd4a   :  { %1105 = vrot.lane.b32.xlu1 %v1958_v36, %s2206_s17 }
 0xdb2   :  { %v1035_v45 = vpop.permute.xlu0 %1034 }
 0xdb3   :  { %v1037_v46 = vmul.f32 %v1035_v45, %v1018_v16 }
 0xdb5   :  { %v1117_v58 = vpack.c.bf16 %v1037_v46, %v1037_v46 }
 0xdb7   :  { %1119 = vrot.lane.b32.xlu2 %v1117_v58, %s2214_s1 }
 0xdbc   :  { %v1106_v59 = vpop.permute.xlu1 %1105 }
 0xdbd   :  { %v2563_v61 = vmul.f32 %v1106_v59, %v1089_v40 }
 0xdbf   :  { %v1175_v48 = vpack.c.bf16 %v2563_v61, %v2563_v61 }
 0xdc1   :  { %1177 = vrot.lane.b32.xlu0 %v1175_v48, %s2214_s1 }
 0xe11   :  { %v1120_v31 = vpop.permute.xlu2 %1119 }
 0xe12   :  { %1799 = vmatmul.msk.bf16.vlgmr.msra.gmra.mxu3 %vm154_vm0, %v1120_v31  ;;  %1802 = vmatmul.msk.bf16.vlgmr.msrb.gmra.mxu0 %vm154_vm0, %v1120_v31 }
 0xe33   :  { %v1178_v7 = vpop.permute.xlu0 %1177 }
 0xe34   :  { %1801 = vmatmul.msk.bf16.vlgmr.msra.gmra.mxu1 %vm154_vm0, %v1178_v7 }
 0xe8f   :  { %v1204_v12 = vpop.f32.mrf.mxu0 }
 0xe95   :  { %v1133_v49 = vpop.f32.mrf.mxu3 }
 0xe96   :  { %v1137_v62 = vadd.f32 %v1133_v49, %v2376_v55 }
 0xe97   :  { %v1206_v63 = vpop.f32.mrf.mxu0 }
 0xe98   :  { %1959 = vtanh.f32 %v1137_v62  ;;  %v1800_v22 = vmul.f32 -1.442695, %v1137_v62 }
 0xe9d   :  { %v1135_v0 = vpop.f32.mrf.mxu3 }
 0xe9e   :  { %v1960_v1 = vpop.eup %1959 }
 0xe9f   :  { %1160 = vrot.lane.b32.xlu1 %v1960_v1, %s2206_s17 }
 0xeb1   :  { %v1191_v23 = vpop.f32.mrf.mxu1 }
 0xeb2   :  { %v1205_v26 = vadd.f32 %v1204_v12, %v1191_v23 }
 0xeb4   :  { %v1208_v2 = vadd.f32 %v2421_v35, %v1205_v26  ;;  %v2600_v26 = vld [vmem:[%s2735_s9] ss:$0 sm:$0xff] }
 0xeb6   :  { %1961 = vtanh.f32 %v1208_v2  ;;  %v1803_v24 = vmul.f32 -1.442695, %v1208_v2 }
 0xeb7   :  { %1963 = vpow2.f32 %v1800_v22 }
 0xeb8   :  { %1965 = vpow2.f32 %v1803_v24 }
 0xeb9   :  { %v1193_v47 = vpop.f32.mrf.mxu1 }
 0xebc   :  { %v1962_v3 = vpop.eup %1961 }
 0xebd   :  { %1231 = vrot.lane.b32.xlu2 %v1962_v3, %s2206_s17  ;;  %v1964_v53 = vpop.eup %1963 }
 0xebe   :  { %v1141_v55 = vadd.f32 1.0, %v1964_v53  ;;  %v1966_v4 = vpop.eup %1965 }
 0xebf   :  { %v1212_v51 = vadd.f32 1.0, %v1966_v4 }
 0xec0   :  { %1967 = vrcp.f32 %v1141_v55  ;;  %v1153_v14 = vand.u32 2147483648, %v1141_v55  ;;  %vm1147_vm2 = vweird.f32 %v1141_v55  ;;  %v1151_v15 = vand.u32 2147483647, %v1141_v55 }
 0xec1   :  { %1969 = vrcp.f32 %v1212_v51  ;;  %v1224_v28 = vand.u32 2147483648, %v1212_v51  ;;  %vm1218_vm6 = vweird.f32 %v1212_v51  ;;  %v1222_v30 = vand.u32 2147483647, %v1212_v51 }
 0xec2   :  { %v1154_v18 = vor.u32 1.1754944e-38, %v1153_v14  ;;  %vm1152_vm4 = vcmp.eq.f32.partialorder %v1151_v15, 8.507059e+37 }
 0xec3   :  { %v1225_v33 = vor.u32 1.1754944e-38, %v1224_v28  ;;  %vm1223_vm8 = vcmp.eq.f32.partialorder %v1222_v30, 8.507059e+37 }
 0xec6   :  { %v1968_v5 = vpop.eup %1967 }
 0xec7   :  { %v1143_v6 = vmul.f32 %v1968_v5, %v1141_v55  ;;  %v1970_v8 = vpop.eup %1969  ;;  %vm1148_vm1 = vweird.f32 %v1968_v5 }
 0xec8   :  { %v1214_v35 = vmul.f32 %v1970_v8, %v1212_v51  ;;  %vm1149_vm3 = vmor %vm1147_vm2, %vm1148_vm1  ;;  %vm1219_vm5 = vweird.f32 %v1970_v8 }
 0xec9   :  { %v1144_v9 = vsub.f32 1.0, %v1143_v6  ;;  %vm1220_vm7 = vmor %vm1218_vm6, %vm1219_vm5 }
 0xeca   :  { %v1215_v11 = vsub.f32 1.0, %v1214_v35 }
 0xecb   :  { %v1145_v10 = vmul.f32 %v1968_v5, %v1144_v9 }
 0xecc   :  { %v1216_v16 = vmul.f32 %v1970_v8, %v1215_v11 }
 0xecd   :  { %v1146_v13 = vadd.f32 %v1968_v5, %v1145_v10 }
 0xece   :  { %v1217_v19 = vadd.f32 %v1970_v8, %v1216_v16 }
 0xecf   :  { %v1150_v17 = vsel %vm1149_vm3, %v1968_v5, %v1146_v13 }
 0xed0   :  { %v1155_v21 = vsel %vm1152_vm4, %v1154_v18, %v1150_v17  ;;  %v1221_v32 = vsel %vm1220_vm7, %v1970_v8, %v1217_v19 }
 0xed1   :  { %v1226_v38 = vsel %vm1223_vm8, %v1225_v33, %v1221_v32  ;;  %v1158_v40 = vmul.f32 %v1155_v21, %v2553_v27 }
 0xed2   :  { %v1229_v43 = vmul.f32 %v1226_v38, %v2558_v56 }
 0xf11   :  { %v1161_v25 = vpop.permute.xlu1 %1160 }
 0xf12   :  { %v1163_v29 = vmul.f32 %v1161_v25, %v1155_v21 }
 0xf14   :  { %1165 = vrot.lane.b32.xlu0 %v1163_v29, %s2214_s1 }
 0xf17   :  { %v1232_v37 = vpop.permute.xlu2 %1231 }
 0xf18   :  { %v1234_v20 = vmul.f32 %v1232_v37, %v1226_v38 }
 0xf1a   :  { %1236 = vrot.lane.b32.xlu1 %v1234_v20, %s2214_s1 }
 0xf86   :  { %v1166_v41 = vpop.permute.xlu0 %1165 }
 0xf87   :  { %v2578_v42 = vadd.f32 %v1166_v41, %v1158_v40 }
 0xf89   :  { %1971 = vtanh.f32 %v2578_v42 }
 0xf8c   :  { %v1237_v50 = vpop.permute.xlu1 %1236 }
 0xf8d   :  { %v2582_v39 = vadd.f32 %v1237_v50, %v1229_v43 }
 0xf8f   :  { %v1972_v52 = vpop.eup %1971  ;;  %1973 = vtanh.f32 %v2582_v39 }
 0xf90   :  { %1171 = vrot.lane.b32.xlu2 %v1972_v52, %s2206_s17 }
 0xf95   :  { %v1974_v36 = vpop.eup %1973 }
 0xf96   :  { %1242 = vrot.lane.b32.xlu0 %v1974_v36, %s2206_s17 }
 0xfea   :  { %v1172_v45 = vpop.permute.xlu2 %1171 }
 0xfeb   :  { %v1174_v27 = vmul.f32 %v1172_v45, %v1155_v21 }
 0xfed   :  { %v1254_v46 = vpack.c.bf16 %v1174_v27, %v1174_v27  ;;  %v2215_v27 = vmov 0  }
 0xfee   :  { %1866 = vset.pattern.permute.xlu1 %v2215_v27  ;;  %1867 = vset.pattern.permute.xlu2 %v2215_v27 }
 0xfef   :  { %1256 = vrot.lane.b32.xlu1 %v1254_v46, %s2214_s1  ;;  %1868 = vset.pattern.permute.xlu0 %v2215_v27 }
0x1008   :  { %v1243_v58 = vpop.permute.xlu0 %1242 }
0x1009   :  { %v2588_v59 = vmul.f32 %v1243_v58, %v1226_v38 }
0x100b   :  { %v1312_v56 = vpack.c.bf16 %v2588_v59, %v2588_v59 }
0x100d   :  { %1314 = vrot.lane.b32.xlu2 %v1312_v56, %s2214_s1 }
0x1061   :  { %v1257_v48 = vpop.permute.xlu1 %1256 }
0x1062   :  { %1804 = vmatmul.msk.bf16.vlgmr.msra.gmra.mxu2 %vm154_vm0, %v1257_v48  ;;  %1807 = vmatmul.msk.bf16.vlgmr.msrb.gmra.mxu1 %vm154_vm0, %v1257_v48 }
0x1067   :  { %v1315_v31 = vpop.permute.xlu2 %1314 }
0x1068   :  { %1806 = vmatmul.msk.bf16.vlgmr.msrb.gmra.mxu3 %vm154_vm0, %v1315_v31  ;;  %v1497_v31 = vld [vmem:[%s2728_s2] sm:$0xff] }
0x10df   :  { %v1341_v7 = vpop.f32.mrf.mxu1 }
0x10e5   :  { %v1270_v12 = vpop.f32.mrf.mxu2 }
0x10e6   :  { %v1274_v49 = vadd.f32 %v1270_v12, %v2378_v57 }
0x10e7   :  { %v1343_v62 = vpop.f32.mrf.mxu1 }
0x10e8   :  { %1975 = vtanh.f32 %v1274_v49  ;;  %v1805_v57 = vmul.f32 -1.442695, %v1274_v49 }
0x10eb   :  { %v1328_v63 = vpop.f32.mrf.mxu3 }
0x10ec   :  { %v1342_v0 = vadd.f32 %v1341_v7, %v1328_v63  ;;  %v1501_v7 = vld [vmem:[%s2728_s2 + $0x20] sm:$0xff] }
0x10ed   :  { %v1272_v1 = vpop.f32.mrf.mxu2 }
0x10ee   :  { %v1976_v23 = vpop.eup %1975  ;;  %v1345_v2 = vadd.f32 %v2600_v26, %v1342_v0 }
0x10ef   :  { %1297 = vrot.lane.b32.xlu0 %v1976_v23, %s2206_s17 }
0x10f0   :  { %1977 = vtanh.f32 %v1345_v2  ;;  %v1808_v22 = vmul.f32 -1.442695, %v1345_v2 }
0x10f1   :  { %1979 = vpow2.f32 %v1805_v57  ;;  %v1498_v57 = vld [vmem:[%s2728_s2 + $0x8] sm:$0xff] }
0x10f2   :  { %1981 = vpow2.f32 %v1808_v22  ;;  %v1499_v22 = vld [vmem:[%s2728_s2 + $0x10] sm:$0xff] }
0x10f3   :  { %v1330_v47 = vpop.f32.mrf.mxu3 }
0x10f6   :  { %v1978_v3 = vpop.eup %1977 }
0x10f7   :  { %1368 = vrot.lane.b32.xlu1 %v1978_v3, %s2206_s17  ;;  %v1980_v24 = vpop.eup %1979 }
0x10f8   :  { %v1278_v53 = vadd.f32 1.0, %v1980_v24  ;;  %v1982_v55 = vpop.eup %1981 }
0x10f9   :  { %v1349_v4 = vadd.f32 1.0, %v1982_v55 }
0x10fa   :  { %1983 = vrcp.f32 %v1278_v53  ;;  %v1290_v13 = vand.u32 2147483648, %v1278_v53  ;;  %vm1284_vm10 = vweird.f32 %v1278_v53  ;;  %v1288_v14 = vand.u32 2147483647, %v1278_v53 }
0x10fb   :  { %1985 = vrcp.f32 %v1349_v4  ;;  %v1361_v28 = vand.u32 2147483648, %v1349_v4  ;;  %vm1355_vm14 = vweird.f32 %v1349_v4  ;;  %v1359_v29 = vand.u32 2147483647, %v1349_v4 }
0x10fc   :  { %v1291_v17 = vor.u32 1.1754944e-38, %v1290_v13  ;;  %vm1289_vm12 = vcmp.eq.f32.partialorder %v1288_v14, 8.507059e+37  ;;  %v1845_v13 = vld [vmem:[#allocation20 + $0x4] sm:$0xf0]  ;;  %v1844_v14 = vld [vmem:[#allocation20 + $0x4] sm:$0xf] }
0x10fd   :  { %v1362_v32 = vor.u32 1.1754944e-38, %v1361_v28  ;;  %vm1360_vm1 = vcmp.eq.f32.partialorder %v1359_v29, 8.507059e+37 }
0x1100   :  { %v1984_v51 = vpop.eup %1983 }
0x1101   :  { %v1280_v5 = vmul.f32 %v1984_v51, %v1278_v53  ;;  %v1986_v8 = vpop.eup %1985  ;;  %vm1285_vm9 = vweird.f32 %v1984_v51 }
0x1102   :  { %v1351_v35 = vmul.f32 %v1986_v8, %v1349_v4  ;;  %vm1286_vm11 = vmor %vm1284_vm10, %vm1285_vm9  ;;  %vm1356_vm13 = vweird.f32 %v1986_v8 }
0x1103   :  { %v1281_v6 = vsub.f32 1.0, %v1280_v5  ;;  %vm1357_vm15 = vmor %vm1355_vm14, %vm1356_vm13  ;;  %v1847_v5 = vld [vmem:[#allocation20 + $0x14] sm:$0xf0] }
0x1104   :  { %v1352_v11 = vsub.f32 1.0, %v1351_v35  ;;  %v1824_v35 = vld [vmem:[#allocation20 + $0x18] sm:$0xf0] }
0x1105   :  { %v1282_v9 = vmul.f32 %v1984_v51, %v1281_v6  ;;  %v1846_v6 = vld [vmem:[#allocation20 + $0x14] sm:$0xf] }
0x1106   :  { %v1353_v16 = vmul.f32 %v1986_v8, %v1352_v11  ;;  %v1814_v11 = vld [vmem:[#allocation20] sm:$0xf] }
0x1107   :  { %v1283_v10 = vadd.f32 %v1984_v51, %v1282_v9 }
0x1108   :  { %v1354_v25 = vadd.f32 %v1986_v8, %v1353_v16  ;;  %v1815_v16 = vor.u32 %v1845_v13, %v1814_v11 }
0x1109   :  { %v1287_v15 = vsel %vm1286_vm11, %v1984_v51, %v1283_v10  ;;  %v1822_v51 = vld [vmem:[#allocation20 + $0x10] sm:$0xf]  ;;  %v1827_v10 = vor.u32 %v1846_v6, %v1824_v35 }
0x110a   :  { %v1292_v19 = vsel %vm1289_vm12, %v1291_v17, %v1287_v15  ;;  %v1358_v30 = vsel %vm1357_vm15, %v1986_v8, %v1354_v25  ;;  %v1823_v9 = vor.u32 %v1847_v5, %v1822_v51  ;;  %v1816_v17 = vld [vmem:[#allocation20 + $0x8] sm:$0xf0] }
0x110b   :  { %v1363_v37 = vsel %vm1360_vm1, %v1362_v32, %v1358_v30  ;;  %v1295_v20 = vmul.f32 %v1292_v19, %v2578_v42  ;;  %1652 = vmatpush.bf16.msra.mxu1 %v1827_v10 }
0x110c   :  { %v1366_v50 = vmul.f32 %v1363_v37, %v2582_v39  ;;  %1623 = vmatpush.bf16.msra.mxu3 %v1823_v9 }
0x1110   :  { %1624 = vmatpush.bf16.msra.mxu3 %v1815_v16 }
0x1161   :  { %v1298_v18 = vpop.permute.xlu0 %1297 }
0x1162   :  { %v1300_v21 = vmul.f32 %v1298_v18, %v1292_v19  ;;  %v1819_v18 = vor.u32 %v1844_v14, %v1816_v17 }
0x1164   :  { %1302 = vrot.lane.b32.xlu2 %v1300_v21, %s2214_s1  ;;  %1653 = vmatpush.bf16.msra.mxu1 %v1819_v18 }
0x1169   :  { %v1369_v33 = vpop.permute.xlu1 %1368 }
0x116a   :  { %v1371_v38 = vmul.f32 %v1369_v33, %v1363_v37 }
0x116c   :  { %1373 = vrot.lane.b32.xlu0 %v1371_v38, %s2214_s1 }
0x11be   :  { %v1303_v40 = vpop.permute.xlu2 %1302 }
0x11bf   :  { %v1305_v41 = vadd.f32 %v1303_v40, %v1295_v20 }
0x11c1   :  { %1987 = vtanh.f32 %v1305_v41 }
0x11c7   :  { %v1988_v43 = vpop.eup %1987 }
0x11c8   :  { %1308 = vrot.lane.b32.xlu1 %v1988_v43, %s2206_s17 }
0x11de   :  { %v1374_v52 = vpop.permute.xlu0 %1373 }
0x11df   :  { %v2610_v36 = vadd.f32 %v1374_v52, %v1366_v50 }
0x11e1   :  { %1989 = vtanh.f32 %v2610_v36 }
0x11e7   :  { %v1990_v45 = vpop.eup %1989 }
0x11e8   :  { %1379 = vrot.lane.b32.xlu2 %v1990_v45, %s2206_s17 }
0x123a   :  { %v1309_v42 = vpop.permute.xlu1 %1308 }
0x123b   :  { %v2614_v46 = vmul.f32 %v1309_v42, %v1292_v19 }
0x123d   :  { %v1389_v58 = vpack.c.bf16 %v2614_v46, %v2614_v46 }
0x123f   :  { %1411 = vrot.lane.b32.xlu0 %v1389_v58, %s2214_s1 }
0x1242   :  { %v1380_v39 = vpop.permute.xlu2 %1379 }
0x1243   :  { %v2619_v56 = vmul.f32 %v1380_v39, %v1363_v37 }
0x1245   :  { %v1390_v48 = vpack.c.bf16 %v2619_v56, %v2619_v56 }
0x1247   :  { %1392 = vrot.lane.b32.xlu1 %v1390_v48, %s2214_s1 }
0x124f   :  { %563 = vrot.lane.b32.xlu1 %v2438_v34, %s2214_s1 }
0x1257   :  { %1507 = vperm.xlu1 %1866, %v1497_v31  }
0x125f   :  { %973 = vrot.lane.b32.xlu1 %v2532_v60, %s2214_s1 }
0x1267   :  { %1110 = vrot.lane.b32.xlu1 %v2563_v61, %s2214_s1 }
0x126f   :  { %1527 = vperm.xlu1 %1866, %v1501_v7  }
0x12b1   :  { %v1412_v12 = vpop.permute.xlu0 %1411 }
0x12b2   :  { %1810 = vmatmul.msk.bf16.vlgmr.msrb.gmra.mxu2 %vm154_vm0, %v1412_v12 }
0x12b9   :  { %v1393_v34 = vpop.permute.xlu1 %1392 }
0x12ba   :  { %1809 = vmatmul.msk.bf16.vlgmr.msra.gmra.mxu0 %vm154_vm0, %v1393_v34 }
0x12c1   :  { %v564_v49 = vpop.permute.xlu1 %563 }
0x12c2   :  { %566 = vst.msk [vmem:[#allocation8] sm:$0xff] %vm154_vm0, %v564_v49 }
0x12c9   :  { %v2639_v62 = vpop.permute.xlu1 %1507  ;;  %v1489_v38 = vld [vmem:[#allocation8] sm:$0xff] }
0x12ca   :  { %v1545_v20 = vmul.f32 %v2639_v62, %v1489_v38 }
0x12cc   :  { %v1553_v43 = vpack.c.bf16 %v1545_v20, %v1545_v20 }
0x12ce   :  { %v1573_v45 = vunpack.c.l.b16 %v1553_v43 }
0x12d1   :  { %v974_v60 = vpop.permute.xlu1 %973 }
0x12d2   :  { %977 = vst.msk [vmem:[#allocation8 + $0x18] sm:$0xff] %vm154_vm0, %v974_v60  ;;  %v1500_v60 = vld [vmem:[%s2728_s2 + $0x18] sm:$0xff] }
0x12d9   :  { %v1111_v61 = vpop.permute.xlu1 %1110 }
0x12da   :  { %1114 = vst.msk [vmem:[#allocation8 + $0x20] sm:$0xff] %vm154_vm0, %v1111_v61  ;;  %v1675_v61 = vld [vmem:[%s2737_s11] sm:$0x3] }
0x12e1   :  { %v1493_v11 = vld [vmem:[#allocation8 + $0x20] sm:$0xff] }
0x1335   :  { %v1425_v63 = vpop.f32.mrf.mxu2 }
0x1337   :  { %v1406_v0 = vpop.f32.mrf.mxu0 }
0x1338   :  { %v1426_v1 = vadd.f32 %v1425_v63, %v1406_v0  ;;  %v2681_v63 = vperm.slane %v1675_v61, 1 }
0x133a   :  { %v1429_v23 = vadd.f32 %v2600_v26, %v1426_v1  ;;  %v1502_v26 = vld [vmem:[%s2728_s2 + $0x28] sm:$0xff]  ;;  %v2686_v1 = vperm.slane %v1675_v61, 0 }
0x133c   :  { %1991 = vtanh.f32 %v1429_v23  ;;  %v1811_v24 = vmul.f32 -1.442695, %v1429_v23  ;;  %v1504_v23 = vld [vmem:[%s2728_s2 + $0x38] sm:$0xff] }
0x133d   :  { %v1427_v2 = vpop.f32.mrf.mxu2 }
0x133e   :  { %1993 = vpow2.f32 %v1811_v24 }
0x133f   :  { %v1408_v47 = vpop.f32.mrf.mxu0 }
0x1342   :  { %v1992_v3 = vpop.eup %1991 }
0x1343   :  { %1452 = vrot.lane.b32.xlu2 %v1992_v3, %s2206_s17 }
0x1344   :  { %v1994_v53 = vpop.eup %1993 }
0x1345   :  { %v1433_v55 = vadd.f32 1.0, %v1994_v53  ;;  %v1492_v53 = vld [vmem:[#allocation8 + $0x18] sm:$0xff] }
0x1347   :  { %1995 = vrcp.f32 %v1433_v55  ;;  %v1445_v21 = vand.u32 2147483648, %v1433_v55  ;;  %vm1439_vm3 = vweird.f32 %v1433_v55  ;;  %v1443_v25 = vand.u32 2147483647, %v1433_v55 }
0x1349   :  { %v1446_v29 = vor.u32 1.1754944e-38, %v1445_v21  ;;  %vm1444_vm5 = vcmp.eq.f32.partialorder %v1443_v25, 8.507059e+37 }
0x134b   :  { %699 = vrot.lane.b32.xlu2 %v2469_v44, %s2214_s1  ;;  %v1503_v44 = vld [vmem:[%s2728_s2 + $0x30] sm:$0xff]  ;;  %s2217_s2 = smov [#allocation21]  }
0x134c   :  { %s1717_s11 = sshll.u32 %s2217_s2, 4  ;;  %s1718_s11 = int_to_ptr.vmem [resolvable:$true] %s1717_s11 }
0x134d   :  { %v1996_v4 = vpop.eup %1995 }
0x134e   :  { %vm1440_vm2 = vweird.f32 %v1996_v4 }
0x134f   :  { %vm1441_vm4 = vmor %vm1439_vm3, %vm1440_vm2 }
0x1353   :  { %1512 = vperm.xlu2 %1867, %v1498_v57  }
0x135b   :  { %1517 = vperm.xlu2 %1867, %v1499_v22  }
0x1363   :  { %1247 = vrot.lane.b32.xlu2 %v2588_v59, %s2214_s1  ;;  %v1435_v59 = vmul.f32 %v1996_v4, %v1433_v55 }
0x1365   :  { %v1436_v8 = vsub.f32 1.0, %v1435_v59 }
0x1367   :  { %v1437_v15 = vmul.f32 %v1996_v4, %v1436_v8 }
0x1369   :  { %v1438_v19 = vadd.f32 %v1996_v4, %v1437_v15 }
0x136b   :  { %1532 = vperm.xlu2 %1867, %v1502_v26   ;;  %v1442_v28 = vsel %vm1441_vm4, %v1996_v4, %v1438_v19 }
0x136c   :  { %v1447_v32 = vsel %vm1444_vm5, %v1446_v29, %v1442_v28 }
0x136d   :  { %v1450_v12 = vmul.f32 %v1447_v32, %v2610_v36 }
0x1373   :  { %1537 = vperm.xlu2 %1867, %v1503_v44  }
0x137b   :  { %1479 = vrot.lane.b32.xlu2 %v1305_v41, %s2216_s8 }
0x139d   :  { %v1453_v30 = vpop.permute.xlu2 %1452 }
0x139e   :  { %v1455_v33 = vmul.f32 %v1453_v30, %v1447_v32 }
0x13a0   :  { %1457 = vrot.lane.b32.xlu0 %v1455_v33, %s2214_s1 }
0x13a5   :  { %v700_v37 = vpop.permute.xlu2 %699 }
0x13a6   :  { %703 = vst.msk [vmem:[#allocation8 + $0x8] sm:$0xff] %vm154_vm0, %v700_v37 }
0x13ad   :  { %v1490_v40 = vld [vmem:[#allocation8 + $0x8] sm:$0xff]  ;;  %v1513_v41 = vpop.permute.xlu2 %1512 }
0x13ae   :  { %v1546_v50 = vmul.f32 %v1513_v41, %v1490_v40 }
0x13b0   :  { %v1554_v52 = vpack.c.bf16 %v1546_v50, %v1546_v50 }
0x13b2   :  { %v1574_v27 = vunpack.c.l.b16 %v1554_v52 }
0x13b4   :  { %v1581_v42 = vpack.c.b16 %v1574_v27, %v1573_v45 }
0x13b5   :  { %v1518_v58 = vpop.permute.xlu2 %1517 }
0x13b6   :  { %1828 = vmatmul.msk.bf16.vlgmr.msra.gmra.mxu3 %vm154_vm0, %v1581_v42  ;;  %1832 = vmatmul.msk.bf16.vlgmr.msra.gmra.mxu1 %vm154_vm0, %v1581_v42 }
0x13bd   :  { %v1248_v39 = vpop.permute.xlu2 %1247 }
0x13be   :  { %1251 = vst.msk [vmem:[#allocation8 + $0x28] sm:$0xff] %vm154_vm0, %v1248_v39 }
0x13c5   :  { %v1533_v48 = vpop.permute.xlu2 %1532  ;;  %v1494_v35 = vld [vmem:[#allocation8 + $0x28] sm:$0xff] }
0x13c6   :  { %v1550_v13 = vmul.f32 %v1533_v48, %v1494_v35 }
0x13c8   :  { %v1558_v15 = vpack.c.bf16 %v1550_v13, %v1550_v13 }
0x13ca   :  { %v1578_v18 = vunpack.c.l.b16 %v1558_v15 }
0x13cd   :  { %v2668_v31 = vpop.permute.xlu2 %1537 }
0x13d5   :  { %v1480_v7 = vpop.permute.xlu2 %1479 }
0x13d6   :  { %1482 = vst.msk [vmem:[#allocation4] sm:$0xff] %vm154_vm0, %v1480_v7 }
0x1412   :  { %v1458_v34 = vpop.permute.xlu0 %1457 }
0x1413   :  { %v1460_v49 = vadd.f32 %v1458_v34, %v1450_v12 }
0x1415   :  { %1997 = vtanh.f32 %v1460_v49 }
0x141b   :  { %v1998_v62 = vpop.eup %1997 }
0x141c   :  { %1463 = vrot.lane.b32.xlu0 %v1998_v62, %s2206_s17 }
0x1424   :  { %836 = vrot.lane.b32.xlu0 %v2500_v54, %s2214_s1 }
0x142c   :  { %1522 = vperm.xlu0 %1868, %v1500_v60  }
0x1433   :  { %v1655_v36 = vpop.f32.mrf.mxu1 }
0x1434   :  { %v1682_v0 = vadd.f32 %v2681_v63, %v1655_v36  ;;  %1384 = vrot.lane.b32.xlu0 %v2619_v56, %s2214_s1 }
0x1436   :  { %1698 = vst [vmem:[#allocation21 + $0x8] sm:$0xff] %v1682_v0 }
0x1439   :  { %v1626_v54 = vpop.f32.mrf.mxu3 }
0x143a   :  { %v1681_v2 = vadd.f32 %v2686_v1, %v1626_v54 }
0x143b   :  { %v1657_v47 = vpop.f32.mrf.mxu1 }
0x143c   :  { %1697 = vst [vmem:[#allocation21] sm:$0xff] %v1681_v2  ;;  %v1684_v3 = vadd.f32 %v2681_v63, %v1657_v47  ;;  %1542 = vperm.xlu0 %1868, %v1504_v23  }
0x143e   :  { %1700 = vst [vmem:[#allocation21 + $0x18] sm:$0xff] %v1684_v3 }
0x1441   :  { %v1628_v57 = vpop.f32.mrf.mxu3 }
0x1442   :  { %v1683_v22 = vadd.f32 %v2686_v1, %v1628_v57 }
0x1444   :  { %1699 = vst [vmem:[#allocation21 + $0x10] sm:$0xff] %v1683_v22  ;;  %1485 = vrot.lane.b32.xlu0 %v1460_v49, %s2216_s8 }
0x148e   :  { %v1464_v56 = vpop.permute.xlu0 %1463 }
0x148f   :  { %v1466_v26 = vmul.f32 %v1464_v56, %v1447_v32 }
0x1491   :  { %1468 = vrot.lane.b32.xlu1 %v1466_v26, %s2214_s1 }
0x1496   :  { %v837_v24 = vpop.permute.xlu0 %836 }
0x1497   :  { %840 = vst.msk [vmem:[#allocation8 + $0x10] sm:$0xff] %vm154_vm0, %v837_v24 }
0x1499   :  { %1474 = vrot.lane.b32.xlu1 %v2614_v46, %s2214_s1  ;;  %v1528_v46 = vpop.permute.xlu1 %1527  ;;  %s2219_s1 = smov 16  }
0x149a   :  { %v1549_v14 = vmul.f32 %v1528_v46, %v1493_v11 }
0x149c   :  { %v1557_v17 = vpack.c.bf16 %v1549_v14, %v1549_v14 }
0x149e   :  { %v1491_v44 = vld [vmem:[#allocation8 + $0x10] sm:$0xff]  ;;  %v1523_v55 = vpop.permute.xlu0 %1522  ;;  %v1577_v19 = vunpack.c.l.b16 %v1557_v17 }
0x149f   :  { %v1547_v4 = vmul.f32 %v1518_v58, %v1491_v44  ;;  %v1548_v59 = vmul.f32 %v1523_v55, %v1492_v53 }
0x14a0   :  { %v1583_v21 = vpack.c.b16 %v1578_v18, %v1577_v19 }
0x14a1   :  { %v1555_v51 = vpack.c.bf16 %v1547_v4, %v1547_v4  ;;  %v1556_v5 = vpack.c.bf16 %v1548_v59, %v1548_v59 }
0x14a3   :  { %v1575_v6 = vunpack.c.l.b16 %v1555_v51  ;;  %v1576_v8 = vunpack.c.l.b16 %v1556_v5 }
0x14a5   :  { %v1582_v9 = vpack.c.b16 %v1576_v8, %v1575_v6 }
0x14a6   :  { %v1385_v10 = vpop.permute.xlu0 %1384 }
0x14a7   :  { %1388 = vst.msk [vmem:[#allocation8 + $0x30] sm:$0xff] %vm154_vm0, %v1385_v10  ;;  %1829 = vmatmul.msk.bf16.gmra.mxu3 %vm154_vm0, %v1582_v9  ;;  %1833 = vmatmul.msk.bf16.gmra.mxu1 %vm154_vm0, %v1582_v9 }
0x14ae   :  { %v1543_v16 = vpop.permute.xlu0 %1542  ;;  %v1495_v29 = vld [vmem:[#allocation8 + $0x30] sm:$0xff] }
0x14af   :  { %v1551_v30 = vmul.f32 %v2668_v31, %v1495_v29 }
0x14b1   :  { %v1559_v38 = vpack.c.bf16 %v1551_v30, %v1551_v30 }
0x14b3   :  { %v1579_v40 = vunpack.c.l.b16 %v1559_v38 }
0x14b6   :  { %v1486_v25 = vpop.permute.xlu0 %1485 }
0x14b7   :  { %1488 = vst.msk [vmem:[#allocation6] sm:$0xff] %vm154_vm0, %v1486_v25  ;;  %1830 = vmatmul.msk.bf16.gmra.mxu3 %vm154_vm0, %v1583_v21  ;;  %1834 = vmatmul.msk.bf16.gmra.mxu1 %vm154_vm0, %v1583_v21 }
0x1503   :  { %v1469_v28 = vpop.permute.xlu1 %1468 }
0x1504   :  { %1472 = vst.msk [vmem:[#allocation8 + $0x38] sm:$0xff] %vm154_vm0, %v1469_v28 }
0x1505   :  { %1483 = vst.msk [vmem:[#allocation5] sm:$0xff] %vm154_vm0, %v1469_v28 }
0x150b   :  { %v1475_v32 = vpop.permute.xlu1 %1474  ;;  %v1496_v33 = vld [vmem:[#allocation8 + $0x38] sm:$0xff] }
0x150c   :  { %1477 = vst.msk [vmem:[#allocation3] sm:$0xff] %vm154_vm0, %v1475_v32  ;;  %v1552_v37 = vmul.f32 %v1543_v16, %v1496_v33 }
0x150e   :  { %v1560_v20 = vpack.c.bf16 %v1552_v37, %v1552_v37 }
0x1510   :  { %v1580_v41 = vunpack.c.l.b16 %v1560_v20 }
0x1512   :  { %v1584_v43 = vpack.c.b16 %v1580_v41, %v1579_v40 }
0x1514   :  { %1831 = vmatmul.msk.bf16.gmra.mxu3 %vm154_vm0, %v1584_v43  ;;  %1835 = vmatmul.msk.bf16.gmra.mxu1 %vm154_vm0, %v1584_v43 }
0x1524   :  { %v1660_v50 = vpop.f32.mrf.mxu1 }
0x1525   :  { %v1686_v52 = vadd.f32 %v2681_v63, %v1660_v50 }
0x1527   :  { %1702 = vst [vmem:[#allocation21 + $0x28] sm:$0xff] %v1686_v52 }
0x152a   :  { %v1631_v45 = vpop.f32.mrf.mxu3 }
0x152b   :  { %v1685_v27 = vadd.f32 %v2686_v1, %v1631_v45 }
0x152c   :  { %v1662_v42 = vpop.f32.mrf.mxu1 }
0x152d   :  { %1701 = vst [vmem:[#allocation21 + $0x20] sm:$0xff] %v1685_v27  ;;  %v1688_v58 = vadd.f32 %v2681_v63, %v1662_v42 }
0x152f   :  { %1704 = vst [vmem:[#allocation21 + $0x38] sm:$0xff] %v1688_v58 }
0x1532   :  { %v1633_v39 = vpop.f32.mrf.mxu3 }
0x1533   :  { %v1687_v48 = vadd.f32 %v2686_v1, %v1633_v39 }
0x1534   :  { %v1665_v31 = vpop.f32.mrf.mxu1 }
0x1535   :  { %1703 = vst [vmem:[#allocation21 + $0x30] sm:$0xff] %v1687_v48  ;;  %v1690_v7 = vadd.f32 %v2681_v63, %v1665_v31 }
0x1537   :  { %1706 = vst [vmem:[#allocation21 + $0x48] sm:$0xff] %v1690_v7 }
0x153a   :  { %v1636_v12 = vpop.f32.mrf.mxu3 }
0x153b   :  { %v1689_v34 = vadd.f32 %v2686_v1, %v1636_v12 }
0x153c   :  { %v1667_v49 = vpop.f32.mrf.mxu1 }
0x153d   :  { %1705 = vst [vmem:[#allocation21 + $0x40] sm:$0xff] %v1689_v34  ;;  %v1692_v62 = vadd.f32 %v2681_v63, %v1667_v49 }
0x153f   :  { %1708 = vst [vmem:[#allocation21 + $0x58] sm:$0xff] %v1692_v62 }
0x1542   :  { %v1638_v60 = vpop.f32.mrf.mxu3 }
0x1543   :  { %v1691_v61 = vadd.f32 %v2686_v1, %v1638_v60 }
0x1545   :  { %1707 = vst [vmem:[#allocation21 + $0x50] sm:$0xff] %v1691_v61 }
0x1591   :  { %v1670_v36 = vpop.f32.mrf.mxu1 }
0x1592   :  { %v1694_v0 = vadd.f32 %v2681_v63, %v1670_v36 }
0x1594   :  { %1710 = vst [vmem:[#allocation21 + $0x68] sm:$0xff] %v1694_v0 }
0x1597   :  { %v1641_v54 = vpop.f32.mrf.mxu3 }
0x1598   :  { %v1693_v23 = vadd.f32 %v2686_v1, %v1641_v54 }
0x1599   :  { %v1672_v2 = vpop.f32.mrf.mxu1 }
0x159a   :  { %1709 = vst [vmem:[#allocation21 + $0x60] sm:$0xff] %v1693_v23  ;;  %v1696_v47 = vadd.f32 %v2681_v63, %v1672_v2 }
0x159c   :  { %1712 = vst [vmem:[#allocation21 + $0x78] sm:$0xff] %v1696_v47 }
0x159f   :  { %v1643_v3 = vpop.f32.mrf.mxu3 }
0x15a0   :  { %v1695_v57 = vadd.f32 %v2686_v1, %v1643_v3 }
0x15a2   :  { %1711 = vst [vmem:[#allocation21 + $0x70] sm:$0xff] %v1695_v57 }
0x15a3   :  { %1725 = dma.vmem_to_hbm [thread:$0]  %s1718_s11, 2048, %s1720_s14, [#allocation11], %s2218_s15, %s2218_s15, %s2219_s1  }
0x15a4   :  { %2200 = dma.done.wait [#allocation11], 2048  }
0x15a5   :  { %2201 = vsyncadd [#allocation11], 4294965248 }
0x15a6   :  { %1730 = vsyncpa [#allocation10], 1 }
0x15a7   :  { %1731 = vsyncpa [#allocation13], 1 }
0x15a8   :  { %1732 = vsyncpa [#allocation16], 1 }
0x15a9   :  { %1733 = vsyncpa [#allocation19], 1 }
0x15aa   :  { %1734 = vsyncpa [#allocation11], 1 }

</bundles_post_ra>
